<compile_context>
chip_gen: v7x
topology: tpu7x:2x2x1
jax: 0.10.0
libtpu: 0.0.40
codegen_flags: <defaults>
</compile_context>

<pallas_src>
import functools

import jax
import jax.numpy as jnp
from jax.experimental import pallas as pl
from jax.experimental.pallas import tpu as pltpu


def _rnn_kernel(x2d_ref, w_ih_t_ref, w_hh_t_ref, b_ref, w_lc_t_ref, b_lc_ref,
                out_ref, *, B, T):
    """Whole sequence in one invocation.

    x2d_ref:    (T*B, I)  time-major flattened input (rows [t*B:(t+1)*B] = step t)
    w_ih_t_ref: (I, H)    W_ih^T
    w_hh_t_ref: (H, H)    W_hh^T
    b_ref:      (1, H)    b_ih + b_hh (fused)
    w_lc_t_ref: (H, O)    W_lc^T
    b_lc_ref:   (1, O)
    out_ref:    (B, O)
    """
    assert T >= 1, "n_steps must be >= 1"

    # Hoisted, non-recurrent input projection: ONE MXU matmul for all T steps.
    xw = (
        jnp.dot(x2d_ref[...], w_ih_t_ref[...], preferred_element_type=jnp.float32)
        + b_ref[...]
    )                                                   # (T*B, H)

    w_hh_t = w_hh_t_ref[...]                            # (H, H), loop-invariant

    # Recurrence with h carried as an SSA value (no scratch, no VMEM round trips).
    # h_{-1} = 0 (init_hidden), so the W_hh term vanishes at t = 0.
    h = jnp.tanh(xw[0:B, :])
    for t in range(1, T):                               # T static -> fully unrolled
        h = jnp.tanh(
            xw[t * B:(t + 1) * B, :]
            + jnp.dot(h, w_hh_t, preferred_element_type=jnp.float32)
        )

    # Final linear layer on the last hidden state only (== self.lc(self.hidden)).
    out_ref[...] = (
        jnp.dot(h, w_lc_t_ref[...], preferred_element_type=jnp.float32)
        + b_lc_ref[...]
    ).astype(out_ref.dtype)


def prep_params(params):
    """One-time parameter prep — call at parameter-load time, NOT per forward."""
    w_ih, w_hh, b_ih, b_hh, w_lc, b_lc = params
    H = w_hh.shape[0]
    O = w_lc.shape[0]
    return (
        jnp.asarray(w_ih.T, jnp.float32),                       # (I, H)
        jnp.asarray(w_hh.T, jnp.float32),                       # (H, H)
        (b_ih + b_hh).reshape(1, H).astype(jnp.float32),        # (1, H)
        jnp.asarray(w_lc.T, jnp.float32),                       # (H, O)
        b_lc.reshape(1, O).astype(jnp.float32),                 # (1, O)
    )


@jax.jit
def rnn_classifier_forward(x, prepped):
    """x: (B, T, I) float32 — same layout the PyTorch module takes. Returns (B, O)."""
    w_ih_t, w_hh_t, b, w_lc_t, b_lc_2d = prepped
    B, T, I = x.shape
    H = w_hh_t.shape[0]
    O = w_lc_t.shape[1]

    # Time-major + flatten so the kernel projects every step with ONE matmul.
    # (Mirrors the module's x.permute(1, 0, 2); a few-KB copy, negligible.)
    x2d = jnp.transpose(x, (1, 0, 2)).reshape(T * B, I)

    vmem = lambda: pl.BlockSpec(memory_space=pltpu.MemorySpace.VMEM)

    out = pl.pallas_call(
        functools.partial(_rnn_kernel, B=B, T=T),
        out_shape=jax.ShapeDtypeStruct((B, O), jnp.float32),
        in_specs=[vmem()] * 6,
        out_specs=vmem(),
    )(x2d, w_ih_t, w_hh_t, b, w_lc_t, b_lc_2d)

    return out  # (B, n_outputs), equivalent to out.view(-1, n_outputs)


def init_params(key, n_inputs, n_neurons, n_outputs):
    """Deterministic synthetic parameters with PyTorch-like uniform init."""
    ks = jax.random.split(key, 6)
    s = 1.0 / jnp.sqrt(jnp.float32(n_neurons))
    w_ih = jax.random.uniform(ks[0], (n_neurons, n_inputs), jnp.float32, -s, s)
    w_hh = jax.random.uniform(ks[1], (n_neurons, n_neurons), jnp.float32, -s, s)
    b_ih = jax.random.uniform(ks[2], (n_neurons,), jnp.float32, -s, s)
    b_hh = jax.random.uniform(ks[3], (n_neurons,), jnp.float32, -s, s)
    w_lc = jax.random.uniform(ks[4], (n_outputs, n_neurons), jnp.float32, -s, s)
    b_lc = jax.random.uniform(ks[5], (n_outputs,), jnp.float32, -s, s)
    return (w_ih, w_hh, b_ih, b_hh, w_lc, b_lc)


def _reference_forward(x, params):
    """Pure-JAX reference matching the PyTorch semantics (sanity check)."""
    w_ih, w_hh, b_ih, b_hh, w_lc, b_lc = params
    hp = jax.lax.Precision.HIGHEST
    x_tm = jnp.transpose(x, (1, 0, 2))                   # (T, B, I)
    B = x_tm.shape[1]
    h0 = jnp.zeros((B, w_hh.shape[0]), jnp.float32)

    def step(h, x_t):
        h_new = jnp.tanh(
            jnp.dot(x_t, w_ih.T, precision=hp) + b_ih
            + jnp.dot(h, w_hh.T, precision=hp) + b_hh
        )
        return h_new, None

    h_last, _ = jax.lax.scan(step, h0, x_tm)
    return jnp.dot(h_last, w_lc.T, precision=hp) + b_lc


if __name__ == "__main__":
    # Module constants (n_inputs=20, n_neurons=150, n_outputs=2, n_steps=28),
    # small batch.  B a multiple of 8 keeps the per-step xw slices sublane-aligned.
    batch, n_steps, n_inputs, n_neurons, n_outputs = 8, 28, 20, 150, 2

    key = jax.random.PRNGKey(0)
    kx, kp = jax.random.split(key)
    x = jax.random.normal(kx, (batch, n_steps, n_inputs), jnp.float32)
    params = init_params(kp, n_inputs, n_neurons, n_outputs)

    prepped = prep_params(params)           # one-time prep, outside the hot path

    out = rnn_classifier_forward(x, prepped)
    out = jax.block_until_ready(out)

    ref = _reference_forward(x, params)
    assert out.shape == (batch, n_outputs), out.shape
    assert jnp.allclose(out, ref, atol=1e-4, rtol=1e-4), (out, ref)

    print("KERNEL_OK")
</pallas_src>

<mosaic_0001>
module attributes {stable_mosaic.version = 11 : i64} {
  func.func @_rnn_kernel(%arg0: memref<224x20xf32, #tpu.memory_space<vmem>>, %arg1: memref<20x150xf32, #tpu.memory_space<vmem>>, %arg2: memref<150x150xf32, #tpu.memory_space<vmem>>, %arg3: memref<1x150xf32, #tpu.memory_space<vmem>>, %arg4: memref<150x2xf32, #tpu.memory_space<vmem>>, %arg5: memref<1x2xf32, #tpu.memory_space<vmem>>, %arg6: memref<8x2xf32, #tpu.memory_space<vmem>>) attributes {dimension_semantics = [], scalar_prefetch = 0 : i64, scratch_operands = 0 : i64, tpu.core_type = #tpu.core_type<tc>} {
    %c0 = arith.constant 0 : index
    %c0_0 = arith.constant 0 : index
    %0 = vector.load %arg0[%c0, %c0_0] : memref<224x20xf32, #tpu.memory_space<vmem>>, vector<224x20xf32>
    %c0_1 = arith.constant 0 : index
    %c0_2 = arith.constant 0 : index
    %1 = vector.load %arg1[%c0_1, %c0_2] : memref<20x150xf32, #tpu.memory_space<vmem>>, vector<20x150xf32>
    %cst = arith.constant dense<0.000000e+00> : vector<224x150xf32>
    %2 = tpu.matmul %0, %1, %cst {dimension_numbers = #tpu.dot_dimension_numbers<[1], [0], [0], [1], [0, 0, 1, 1], [], []>} : vector<224x20xf32>, vector<20x150xf32>, vector<224x150xf32> -> vector<224x150xf32>
    %c0_3 = arith.constant 0 : index
    %c0_4 = arith.constant 0 : index
    %3 = vector.load %arg3[%c0_3, %c0_4] : memref<1x150xf32, #tpu.memory_space<vmem>>, vector<1x150xf32>
    %4 = vector.broadcast %3 : vector<1x150xf32> to vector<224x150xf32>
    %5 = arith.addf %2, %4 : vector<224x150xf32>
    %c0_5 = arith.constant 0 : index
    %c0_6 = arith.constant 0 : index
    %6 = vector.load %arg2[%c0_5, %c0_6] : memref<150x150xf32, #tpu.memory_space<vmem>>, vector<150x150xf32>
    %7 = vector.extract_strided_slice %5 {offsets = [0, 0], sizes = [8, 150], strides = [1, 1]} : vector<224x150xf32> to vector<8x150xf32>
    %8 = math.tanh %7 : vector<8x150xf32>
    %9 = vector.extract_strided_slice %5 {offsets = [8, 0], sizes = [8, 150], strides = [1, 1]} : vector<224x150xf32> to vector<8x150xf32>
    %cst_7 = arith.constant dense<0.000000e+00> : vector<8x150xf32>
    %10 = tpu.matmul %8, %6, %cst_7 {dimension_numbers = #tpu.dot_dimension_numbers<[1], [0], [0], [1], [0, 0, 1, 1], [], []>} : vector<8x150xf32>, vector<150x150xf32>, vector<8x150xf32> -> vector<8x150xf32>
    %11 = arith.addf %9, %10 : vector<8x150xf32>
    %12 = math.tanh %11 : vector<8x150xf32>
    %13 = vector.extract_strided_slice %5 {offsets = [16, 0], sizes = [8, 150], strides = [1, 1]} : vector<224x150xf32> to vector<8x150xf32>
    %cst_8 = arith.constant dense<0.000000e+00> : vector<8x150xf32>
    %14 = tpu.matmul %12, %6, %cst_8 {dimension_numbers = #tpu.dot_dimension_numbers<[1], [0], [0], [1], [0, 0, 1, 1], [], []>} : vector<8x150xf32>, vector<150x150xf32>, vector<8x150xf32> -> vector<8x150xf32>
    %15 = arith.addf %13, %14 : vector<8x150xf32>
    %16 = math.tanh %15 : vector<8x150xf32>
    %17 = vector.extract_strided_slice %5 {offsets = [24, 0], sizes = [8, 150], strides = [1, 1]} : vector<224x150xf32> to vector<8x150xf32>
    %cst_9 = arith.constant dense<0.000000e+00> : vector<8x150xf32>
    %18 = tpu.matmul %16, %6, %cst_9 {dimension_numbers = #tpu.dot_dimension_numbers<[1], [0], [0], [1], [0, 0, 1, 1], [], []>} : vector<8x150xf32>, vector<150x150xf32>, vector<8x150xf32> -> vector<8x150xf32>
    %19 = arith.addf %17, %18 : vector<8x150xf32>
    %20 = math.tanh %19 : vector<8x150xf32>
    %21 = vector.extract_strided_slice %5 {offsets = [32, 0], sizes = [8, 150], strides = [1, 1]} : vector<224x150xf32> to vector<8x150xf32>
    %cst_10 = arith.constant dense<0.000000e+00> : vector<8x150xf32>
    %22 = tpu.matmul %20, %6, %cst_10 {dimension_numbers = #tpu.dot_dimension_numbers<[1], [0], [0], [1], [0, 0, 1, 1], [], []>} : vector<8x150xf32>, vector<150x150xf32>, vector<8x150xf32> -> vector<8x150xf32>
    %23 = arith.addf %21, %22 : vector<8x150xf32>
    %24 = math.tanh %23 : vector<8x150xf32>
    %25 = vector.extract_strided_slice %5 {offsets = [40, 0], sizes = [8, 150], strides = [1, 1]} : vector<224x150xf32> to vector<8x150xf32>
    %cst_11 = arith.constant dense<0.000000e+00> : vector<8x150xf32>
    %26 = tpu.matmul %24, %6, %cst_11 {dimension_numbers = #tpu.dot_dimension_numbers<[1], [0], [0], [1], [0, 0, 1, 1], [], []>} : vector<8x150xf32>, vector<150x150xf32>, vector<8x150xf32> -> vector<8x150xf32>
    %27 = arith.addf %25, %26 : vector<8x150xf32>
    %28 = math.tanh %27 : vector<8x150xf32>
    %29 = vector.extract_strided_slice %5 {offsets = [48, 0], sizes = [8, 150], strides = [1, 1]} : vector<224x150xf32> to vector<8x150xf32>
    %cst_12 = arith.constant dense<0.000000e+00> : vector<8x150xf32>
    %30 = tpu.matmul %28, %6, %cst_12 {dimension_numbers = #tpu.dot_dimension_numbers<[1], [0], [0], [1], [0, 0, 1, 1], [], []>} : vector<8x150xf32>, vector<150x150xf32>, vector<8x150xf32> -> vector<8x150xf32>
    %31 = arith.addf %29, %30 : vector<8x150xf32>
    %32 = math.tanh %31 : vector<8x150xf32>
    %33 = vector.extract_strided_slice %5 {offsets = [56, 0], sizes = [8, 150], strides = [1, 1]} : vector<224x150xf32> to vector<8x150xf32>
    %cst_13 = arith.constant dense<0.000000e+00> : vector<8x150xf32>
    %34 = tpu.matmul %32, %6, %cst_13 {dimension_numbers = #tpu.dot_dimension_numbers<[1], [0], [0], [1], [0, 0, 1, 1], [], []>} : vector<8x150xf32>, vector<150x150xf32>, vector<8x150xf32> -> vector<8x150xf32>
    %35 = arith.addf %33, %34 : vector<8x150xf32>
    %36 = math.tanh %35 : vector<8x150xf32>
    %37 = vector.extract_strided_slice %5 {offsets = [64, 0], sizes = [8, 150], strides = [1, 1]} : vector<224x150xf32> to vector<8x150xf32>
    %cst_14 = arith.constant dense<0.000000e+00> : vector<8x150xf32>
    %38 = tpu.matmul %36, %6, %cst_14 {dimension_numbers = #tpu.dot_dimension_numbers<[1], [0], [0], [1], [0, 0, 1, 1], [], []>} : vector<8x150xf32>, vector<150x150xf32>, vector<8x150xf32> -> vector<8x150xf32>
    %39 = arith.addf %37, %38 : vector<8x150xf32>
    %40 = math.tanh %39 : vector<8x150xf32>
    %41 = vector.extract_strided_slice %5 {offsets = [72, 0], sizes = [8, 150], strides = [1, 1]} : vector<224x150xf32> to vector<8x150xf32>
    %cst_15 = arith.constant dense<0.000000e+00> : vector<8x150xf32>
    %42 = tpu.matmul %40, %6, %cst_15 {dimension_numbers = #tpu.dot_dimension_numbers<[1], [0], [0], [1], [0, 0, 1, 1], [], []>} : vector<8x150xf32>, vector<150x150xf32>, vector<8x150xf32> -> vector<8x150xf32>
    %43 = arith.addf %41, %42 : vector<8x150xf32>
    %44 = math.tanh %43 : vector<8x150xf32>
    %45 = vector.extract_strided_slice %5 {offsets = [80, 0], sizes = [8, 150], strides = [1, 1]} : vector<224x150xf32> to vector<8x150xf32>
    %cst_16 = arith.constant dense<0.000000e+00> : vector<8x150xf32>
    %46 = tpu.matmul %44, %6, %cst_16 {dimension_numbers = #tpu.dot_dimension_numbers<[1], [0], [0], [1], [0, 0, 1, 1], [], []>} : vector<8x150xf32>, vector<150x150xf32>, vector<8x150xf32> -> vector<8x150xf32>
    %47 = arith.addf %45, %46 : vector<8x150xf32>
    %48 = math.tanh %47 : vector<8x150xf32>
    %49 = vector.extract_strided_slice %5 {offsets = [88, 0], sizes = [8, 150], strides = [1, 1]} : vector<224x150xf32> to vector<8x150xf32>
    %cst_17 = arith.constant dense<0.000000e+00> : vector<8x150xf32>
    %50 = tpu.matmul %48, %6, %cst_17 {dimension_numbers = #tpu.dot_dimension_numbers<[1], [0], [0], [1], [0, 0, 1, 1], [], []>} : vector<8x150xf32>, vector<150x150xf32>, vector<8x150xf32> -> vector<8x150xf32>
    %51 = arith.addf %49, %50 : vector<8x150xf32>
    %52 = math.tanh %51 : vector<8x150xf32>
    %53 = vector.extract_strided_slice %5 {offsets = [96, 0], sizes = [8, 150], strides = [1, 1]} : vector<224x150xf32> to vector<8x150xf32>
    %cst_18 = arith.constant dense<0.000000e+00> : vector<8x150xf32>
    %54 = tpu.matmul %52, %6, %cst_18 {dimension_numbers = #tpu.dot_dimension_numbers<[1], [0], [0], [1], [0, 0, 1, 1], [], []>} : vector<8x150xf32>, vector<150x150xf32>, vector<8x150xf32> -> vector<8x150xf32>
    %55 = arith.addf %53, %54 : vector<8x150xf32>
    %56 = math.tanh %55 : vector<8x150xf32>
    %57 = vector.extract_strided_slice %5 {offsets = [104, 0], sizes = [8, 150], strides = [1, 1]} : vector<224x150xf32> to vector<8x150xf32>
    %cst_19 = arith.constant dense<0.000000e+00> : vector<8x150xf32>
    %58 = tpu.matmul %56, %6, %cst_19 {dimension_numbers = #tpu.dot_dimension_numbers<[1], [0], [0], [1], [0, 0, 1, 1], [], []>} : vector<8x150xf32>, vector<150x150xf32>, vector<8x150xf32> -> vector<8x150xf32>
    %59 = arith.addf %57, %58 : vector<8x150xf32>
    %60 = math.tanh %59 : vector<8x150xf32>
    %61 = vector.extract_strided_slice %5 {offsets = [112, 0], sizes = [8, 150], strides = [1, 1]} : vector<224x150xf32> to vector<8x150xf32>
    %cst_20 = arith.constant dense<0.000000e+00> : vector<8x150xf32>
    %62 = tpu.matmul %60, %6, %cst_20 {dimension_numbers = #tpu.dot_dimension_numbers<[1], [0], [0], [1], [0, 0, 1, 1], [], []>} : vector<8x150xf32>, vector<150x150xf32>, vector<8x150xf32> -> vector<8x150xf32>
    %63 = arith.addf %61, %62 : vector<8x150xf32>
    %64 = math.tanh %63 : vector<8x150xf32>
    %65 = vector.extract_strided_slice %5 {offsets = [120, 0], sizes = [8, 150], strides = [1, 1]} : vector<224x150xf32> to vector<8x150xf32>
    %cst_21 = arith.constant dense<0.000000e+00> : vector<8x150xf32>
    %66 = tpu.matmul %64, %6, %cst_21 {dimension_numbers = #tpu.dot_dimension_numbers<[1], [0], [0], [1], [0, 0, 1, 1], [], []>} : vector<8x150xf32>, vector<150x150xf32>, vector<8x150xf32> -> vector<8x150xf32>
    %67 = arith.addf %65, %66 : vector<8x150xf32>
    %68 = math.tanh %67 : vector<8x150xf32>
    %69 = vector.extract_strided_slice %5 {offsets = [128, 0], sizes = [8, 150], strides = [1, 1]} : vector<224x150xf32> to vector<8x150xf32>
    %cst_22 = arith.constant dense<0.000000e+00> : vector<8x150xf32>
    %70 = tpu.matmul %68, %6, %cst_22 {dimension_numbers = #tpu.dot_dimension_numbers<[1], [0], [0], [1], [0, 0, 1, 1], [], []>} : vector<8x150xf32>, vector<150x150xf32>, vector<8x150xf32> -> vector<8x150xf32>
    %71 = arith.addf %69, %70 : vector<8x150xf32>
    %72 = math.tanh %71 : vector<8x150xf32>
    %73 = vector.extract_strided_slice %5 {offsets = [136, 0], sizes = [8, 150], strides = [1, 1]} : vector<224x150xf32> to vector<8x150xf32>
    %cst_23 = arith.constant dense<0.000000e+00> : vector<8x150xf32>
    %74 = tpu.matmul %72, %6, %cst_23 {dimension_numbers = #tpu.dot_dimension_numbers<[1], [0], [0], [1], [0, 0, 1, 1], [], []>} : vector<8x150xf32>, vector<150x150xf32>, vector<8x150xf32> -> vector<8x150xf32>
    %75 = arith.addf %73, %74 : vector<8x150xf32>
    %76 = math.tanh %75 : vector<8x150xf32>
    %77 = vector.extract_strided_slice %5 {offsets = [144, 0], sizes = [8, 150], strides = [1, 1]} : vector<224x150xf32> to vector<8x150xf32>
    %cst_24 = arith.constant dense<0.000000e+00> : vector<8x150xf32>
    %78 = tpu.matmul %76, %6, %cst_24 {dimension_numbers = #tpu.dot_dimension_numbers<[1], [0], [0], [1], [0, 0, 1, 1], [], []>} : vector<8x150xf32>, vector<150x150xf32>, vector<8x150xf32> -> vector<8x150xf32>
    %79 = arith.addf %77, %78 : vector<8x150xf32>
    %80 = math.tanh %79 : vector<8x150xf32>
    %81 = vector.extract_strided_slice %5 {offsets = [152, 0], sizes = [8, 150], strides = [1, 1]} : vector<224x150xf32> to vector<8x150xf32>
    %cst_25 = arith.constant dense<0.000000e+00> : vector<8x150xf32>
    %82 = tpu.matmul %80, %6, %cst_25 {dimension_numbers = #tpu.dot_dimension_numbers<[1], [0], [0], [1], [0, 0, 1, 1], [], []>} : vector<8x150xf32>, vector<150x150xf32>, vector<8x150xf32> -> vector<8x150xf32>
    %83 = arith.addf %81, %82 : vector<8x150xf32>
    %84 = math.tanh %83 : vector<8x150xf32>
    %85 = vector.extract_strided_slice %5 {offsets = [160, 0], sizes = [8, 150], strides = [1, 1]} : vector<224x150xf32> to vector<8x150xf32>
    %cst_26 = arith.constant dense<0.000000e+00> : vector<8x150xf32>
    %86 = tpu.matmul %84, %6, %cst_26 {dimension_numbers = #tpu.dot_dimension_numbers<[1], [0], [0], [1], [0, 0, 1, 1], [], []>} : vector<8x150xf32>, vector<150x150xf32>, vector<8x150xf32> -> vector<8x150xf32>
    %87 = arith.addf %85, %86 : vector<8x150xf32>
    %88 = math.tanh %87 : vector<8x150xf32>
    %89 = vector.extract_strided_slice %5 {offsets = [168, 0], sizes = [8, 150], strides = [1, 1]} : vector<224x150xf32> to vector<8x150xf32>
    %cst_27 = arith.constant dense<0.000000e+00> : vector<8x150xf32>
    %90 = tpu.matmul %88, %6, %cst_27 {dimension_numbers = #tpu.dot_dimension_numbers<[1], [0], [0], [1], [0, 0, 1, 1], [], []>} : vector<8x150xf32>, vector<150x150xf32>, vector<8x150xf32> -> vector<8x150xf32>
    %91 = arith.addf %89, %90 : vector<8x150xf32>
    %92 = math.tanh %91 : vector<8x150xf32>
    %93 = vector.extract_strided_slice %5 {offsets = [176, 0], sizes = [8, 150], strides = [1, 1]} : vector<224x150xf32> to vector<8x150xf32>
    %cst_28 = arith.constant dense<0.000000e+00> : vector<8x150xf32>
    %94 = tpu.matmul %92, %6, %cst_28 {dimension_numbers = #tpu.dot_dimension_numbers<[1], [0], [0], [1], [0, 0, 1, 1], [], []>} : vector<8x150xf32>, vector<150x150xf32>, vector<8x150xf32> -> vector<8x150xf32>
    %95 = arith.addf %93, %94 : vector<8x150xf32>
    %96 = math.tanh %95 : vector<8x150xf32>
    %97 = vector.extract_strided_slice %5 {offsets = [184, 0], sizes = [8, 150], strides = [1, 1]} : vector<224x150xf32> to vector<8x150xf32>
    %cst_29 = arith.constant dense<0.000000e+00> : vector<8x150xf32>
    %98 = tpu.matmul %96, %6, %cst_29 {dimension_numbers = #tpu.dot_dimension_numbers<[1], [0], [0], [1], [0, 0, 1, 1], [], []>} : vector<8x150xf32>, vector<150x150xf32>, vector<8x150xf32> -> vector<8x150xf32>
    %99 = arith.addf %97, %98 : vector<8x150xf32>
    %100 = math.tanh %99 : vector<8x150xf32>
    %101 = vector.extract_strided_slice %5 {offsets = [192, 0], sizes = [8, 150], strides = [1, 1]} : vector<224x150xf32> to vector<8x150xf32>
    %cst_30 = arith.constant dense<0.000000e+00> : vector<8x150xf32>
    %102 = tpu.matmul %100, %6, %cst_30 {dimension_numbers = #tpu.dot_dimension_numbers<[1], [0], [0], [1], [0, 0, 1, 1], [], []>} : vector<8x150xf32>, vector<150x150xf32>, vector<8x150xf32> -> vector<8x150xf32>
    %103 = arith.addf %101, %102 : vector<8x150xf32>
    %104 = math.tanh %103 : vector<8x150xf32>
    %105 = vector.extract_strided_slice %5 {offsets = [200, 0], sizes = [8, 150], strides = [1, 1]} : vector<224x150xf32> to vector<8x150xf32>
    %cst_31 = arith.constant dense<0.000000e+00> : vector<8x150xf32>
    %106 = tpu.matmul %104, %6, %cst_31 {dimension_numbers = #tpu.dot_dimension_numbers<[1], [0], [0], [1], [0, 0, 1, 1], [], []>} : vector<8x150xf32>, vector<150x150xf32>, vector<8x150xf32> -> vector<8x150xf32>
    %107 = arith.addf %105, %106 : vector<8x150xf32>
    %108 = math.tanh %107 : vector<8x150xf32>
    %109 = vector.extract_strided_slice %5 {offsets = [208, 0], sizes = [8, 150], strides = [1, 1]} : vector<224x150xf32> to vector<8x150xf32>
    %cst_32 = arith.constant dense<0.000000e+00> : vector<8x150xf32>
    %110 = tpu.matmul %108, %6, %cst_32 {dimension_numbers = #tpu.dot_dimension_numbers<[1], [0], [0], [1], [0, 0, 1, 1], [], []>} : vector<8x150xf32>, vector<150x150xf32>, vector<8x150xf32> -> vector<8x150xf32>
    %111 = arith.addf %109, %110 : vector<8x150xf32>
    %112 = math.tanh %111 : vector<8x150xf32>
    %113 = vector.extract_strided_slice %5 {offsets = [216, 0], sizes = [8, 150], strides = [1, 1]} : vector<224x150xf32> to vector<8x150xf32>
    %cst_33 = arith.constant dense<0.000000e+00> : vector<8x150xf32>
    %114 = tpu.matmul %112, %6, %cst_33 {dimension_numbers = #tpu.dot_dimension_numbers<[1], [0], [0], [1], [0, 0, 1, 1], [], []>} : vector<8x150xf32>, vector<150x150xf32>, vector<8x150xf32> -> vector<8x150xf32>
    %115 = arith.addf %113, %114 : vector<8x150xf32>
    %116 = math.tanh %115 : vector<8x150xf32>
    %c0_34 = arith.constant 0 : index
    %c0_35 = arith.constant 0 : index
    %117 = vector.load %arg4[%c0_34, %c0_35] : memref<150x2xf32, #tpu.memory_space<vmem>>, vector<150x2xf32>
    %cst_36 = arith.constant dense<0.000000e+00> : vector<8x2xf32>
    %118 = tpu.matmul %116, %117, %cst_36 {dimension_numbers = #tpu.dot_dimension_numbers<[1], [0], [0], [1], [0, 0, 1, 1], [], []>} : vector<8x150xf32>, vector<150x2xf32>, vector<8x2xf32> -> vector<8x2xf32>
    %c0_37 = arith.constant 0 : index
    %c0_38 = arith.constant 0 : index
    %119 = vector.load %arg5[%c0_37, %c0_38] : memref<1x2xf32, #tpu.memory_space<vmem>>, vector<1x2xf32>
    %120 = vector.broadcast %119 : vector<1x2xf32> to vector<8x2xf32>
    %121 = arith.addf %118, %120 : vector<8x2xf32>
    %c0_39 = arith.constant 0 : index
    %c0_40 = arith.constant 0 : index
    %122 = vector.load %arg6[%c0_39, %c0_40] : memref<8x2xf32, #tpu.memory_space<vmem>>, vector<8x2xf32>
    tpu.vector_store %arg6[%c0_39, %c0_40], %121 {strides = array<i32>} : memref<8x2xf32, #tpu.memory_space<vmem>>, vector<8x2xf32>,
    return
  }
}

</mosaic_0001>

<bundles_post_ra>
// kernel: rnn_classifier_forward.1
= control target key start
LH: loop header
LB: loop body
LE: loop exit
PB: predicated region body
PF: predicated region fallthrough
CT: control target
= control target key end

     0   :  { %v3997_v3 = vmov 0.0   ;;  %vm154_vm0 = vcmask 1043456   ;;  %vm69_vm1 = vcmask 162816   ;;  %vm438_vm2 = vcmask 1045504   ;;  %s5198_s1 = inlined_call_operand.vmem [shape: f32[20,150], index: 1, kind: input, shape index: {}]   ;;  %s5199_s2 = inlined_call_operand.vmem [shape: f32[150,150], index: 2, kind: input, shape index: {}]   ;;  %s5200_s0 = inlined_call_operand.vmem [shape: f32[224,20], index: 0, kind: input, shape index: {}]   ;;  %s5201_s3 = inlined_call_operand.vmem [shape: f32[1,150], index: 3, kind: input, shape index: {}]   ;;  %s5202_s4 = inlined_call_operand.vmem [shape: f32[150,2], index: 4, kind: input, shape index: {}]   ;;  %s5203_s5 = inlined_call_operand.vmem [shape: f32[1,2], index: 5, kind: input, shape index: {}]   ;;  %s5204_s6 = inlined_call_operand.vmem [shape: f32[8,2], index: 6, kind: output, shape index: {}]  }
   0x1   :  { %v52_v0 = vld [vmem:[%s5198_s1 + $0x8] sm:$0xff]  ;;  %v54_v1 = vld [vmem:[%s5198_s1 + $0x18] sm:$0xff]  ;;  %v51_v2 = vld [vmem:[%s5198_s1] sm:$0xff]  ;;  %225 = vmatprep.mubr.f32.mxu1 %v3997_v3  ;;  %vm434_vm3 = vcmask 179200   ;;  %vm2650_vm4 = vcmask 15360  }
   0x2   :  { %v2770_v4 = vpack.c.bf16 %v54_v1, %v52_v0  ;;  %v53_v5 = vld [vmem:[%s5198_s1 + $0x10] sm:$0xff]  ;;  %v56_v7 = vld [vmem:[%s5198_s1 + $0x28] sm:$0xf]  ;;  %v397_v9 = vld [vmem:[%s5199_s2 + $0x18] sm:$0xff] }
   0x3   :  { %v2772_v6 = vpack.c.bf16 %v53_v5, %v51_v2  ;;  %v395_v8 = vld [vmem:[%s5199_s2 + $0x8] sm:$0xff]  ;;  %v394_v11 = vld [vmem:[%s5199_s2] sm:$0xff]  ;;  %v396_v12 = vld [vmem:[%s5199_s2 + $0x10] sm:$0xff] }
   0x4   :  { %2771 = vmatprep.subr.bf16.mxu1 %v2770_v4  ;;  %v4056_v10 = vpack.c.bf16 %v397_v9, %v395_v8  ;;  %v4064_v13 = vpack.c.bf16 %v396_v12, %v394_v11  ;;  %v399_v14 = vld [vmem:[%s5199_s2 + $0x28] sm:$0xff]  ;;  %v55_v15 = vld [vmem:[%s5198_s1 + $0x20] sm:$0xf]  ;;  %v401_v16 = vld [vmem:[%s5199_s2 + $0x38] sm:$0xff] }
   0x5   :  { %2773 = vmatpush1.bf16.msra.mxu1 %v2772_v6  ;;  %v23_v17 = vld [vmem:[%s5200_s0] sm:$0xff]  ;;  %v4080_v18 = vpack.c.bf16 %v401_v16, %v399_v14  ;;  %v400_v20 = vld [vmem:[%s5199_s2 + $0x30] sm:$0xff]  ;;  %v403_v21 = vld [vmem:[%s5199_s2 + $0x48] sm:$0xff] }
   0x6   :  { %2656 = vmatprep.subr.msk.mxu1 %vm154_vm0, %v56_v7  ;;  %3207 = vmatprep.subr.bf16.mxu0 %v4056_v10  ;;  %v398_v19 = vld [vmem:[%s5199_s2 + $0x20] sm:$0xff]  ;;  %v405_v22 = vld [vmem:[%s5199_s2 + $0x58] sm:$0xff]  ;;  %v24_v24 = vld [vmem:[%s5200_s0 + $0x8] sm:$0xff] }
   0x7   :  { %3209 = vmatpush1.bf16.msra.mxu0 %v4064_v13  ;;  %v4099_v23 = vpack.c.bf16 %v400_v20, %v398_v19  ;;  %v4106_v25 = vpack.c.bf16 %v405_v22, %v403_v21  ;;  %v402_v26 = vld [vmem:[%s5199_s2 + $0x40] sm:$0xff]  ;;  %v404_v27 = vld [vmem:[%s5199_s2 + $0x50] sm:$0xff]  ;;  %v407_v28 = vld [vmem:[%s5199_s2 + $0x68] sm:$0xff] }
   0x8   :  { %3211 = vmatprep.subr.bf16.mxu0 %v4080_v18  ;;  %v409_v29 = vld [vmem:[%s5199_s2 + $0x78] sm:$0xff]  ;;  %v4124_v30 = vpack.c.bf16 %v404_v27, %v402_v26  ;;  %v25_v31 = vld [vmem:[%s5200_s0 + $0x10] sm:$0xff]  ;;  %v406_v33 = vld [vmem:[%s5199_s2 + $0x60] sm:$0xff] }
   0x9   :  { %2657 = vmatpush1.msk.msra.mxu1 %vm154_vm0, %v55_v15  ;;  %v4131_v32 = vpack.c.bf16 %v409_v29, %v407_v28  ;;  %v408_v34 = vld [vmem:[%s5199_s2 + $0x70] sm:$0xff]  ;;  %v411_v35 = vld [vmem:[%s5199_s2 + $0x88] sm:$0xff]  ;;  %v413_v36 = vld [vmem:[%s5199_s2 + $0x98] sm:$0xff] }
   0xa   :  { %2658 = vmatmul.mubr.msk.f32.vlgmr.msra.gmra.mrb[0].mxu1 %vm69_vm1, %v23_v17  ;;  %2775 = vmatprep.subr.bf16.mxu1 %v4056_v10  ;;  %v4149_v37 = vpack.c.bf16 %v408_v34, %v406_v33  ;;  %v26_v38 = vld [vmem:[%s5200_s0 + $0x18] sm:$0xff]  ;;  %v4156_v39 = vpack.c.bf16 %v413_v36, %v411_v35  ;;  %v410_v40 = vld [vmem:[%s5199_s2 + $0x80] sm:$0xff]  ;;  %v412_v41 = vld [vmem:[%s5199_s2 + $0x90] sm:$0xff] }
   0xb   :  { %2777 = vmatpush1.bf16.msra.mxu1 %v4064_v13  ;;  %231 = vmatprep.mubr.f32.mxu1 %v3997_v3  ;;  %v415_v42 = vld [vmem:[%s5199_s2 + $0xa8] sm:$0xff]  ;;  %v417_v43 = vld [vmem:[%s5199_s2 + $0xb8] sm:$0xff]  ;;  %v4174_v44 = vpack.c.bf16 %v412_v41, %v410_v40  ;;  %v27_v45 = vld [vmem:[%s5200_s0 + $0x20] sm:$0xff] }
   0xc   :  { %2779 = vmatprep.subr.bf16.mxu1 %v4080_v18  ;;  %3213 = vmatpush1.bf16.msra.mxu0 %v4099_v23  ;;  %v4181_v46 = vpack.c.bf16 %v417_v43, %v415_v42  ;;  %v414_v47 = vld [vmem:[%s5199_s2 + $0xa0] sm:$0xff]  ;;  %v416_v48 = vld [vmem:[%s5199_s2 + $0xb0] sm:$0xff]  ;;  %v419_v49 = vld [vmem:[%s5199_s2 + $0xc8] sm:$0xff] }
   0xd   :  { %3215 = vmatprep.subr.bf16.mxu0 %v4106_v25  ;;  %v421_v50 = vld [vmem:[%s5199_s2 + $0xd8] sm:$0xff]  ;;  %v4199_v51 = vpack.c.bf16 %v416_v48, %v414_v47  ;;  %v28_v52 = vld [vmem:[%s5200_s0 + $0x28] sm:$0xff]  ;;  %v418_v54 = vld [vmem:[%s5199_s2 + $0xc0] sm:$0xff] }
   0xe   :  { %2659 = vmatmul.mubr.msk.f32.gmra.mrb[2].mxu1 %vm69_vm1, %v24_v24  ;;  %v4206_v53 = vpack.c.bf16 %v421_v50, %v419_v49  ;;  %v420_v55 = vld [vmem:[%s5199_s2 + $0xd0] sm:$0xff]  ;;  %v423_v56 = vld [vmem:[%s5199_s2 + $0xe8] sm:$0xff]  ;;  %v425_v57 = vld [vmem:[%s5199_s2 + $0xf8] sm:$0xff] }
   0xf   :  { %237 = vmatprep.mubr.f32.mxu1 %v3997_v3  ;;  %2781 = vmatpush1.bf16.msra.mxu1 %v4099_v23  ;;  %v4224_v58 = vpack.c.bf16 %v420_v55, %v418_v54  ;;  %v29_v59 = vld [vmem:[%s5200_s0 + $0x30] sm:$0xff]  ;;  %v4231_v60 = vpack.c.bf16 %v425_v57, %v423_v56  ;;  %v422_v61 = vld [vmem:[%s5199_s2 + $0xe0] sm:$0xff]  ;;  %v427_v63 = vld [vmem:[%s5199_s2 + $0x108] sm:$0xff] }
  0x10   :  { %2783 = vmatprep.subr.bf16.mxu1 %v4106_v25  ;;  %3217 = vmatpush1.bf16.msra.mxu0 %v4124_v30  ;;  %v424_v62 = vld [vmem:[%s5199_s2 + $0xf0] sm:$0xff]  ;;  %v429_v0 = vld [vmem:[%s5199_s2 + $0x118] sm:$0xff]  ;;  %v426_v5 = vld [vmem:[%s5199_s2 + $0x100] sm:$0xff] }
  0x11   :  { %3219 = vmatprep.subr.bf16.mxu0 %v4131_v32  ;;  %v4249_v1 = vpack.c.bf16 %v424_v62, %v422_v61  ;;  %v30_v2 = vld [vmem:[%s5200_s0 + $0x38] sm:$0xff]  ;;  %v4256_v4 = vpack.c.bf16 %v429_v0, %v427_v63  ;;  %v428_v6 = vld [vmem:[%s5199_s2 + $0x110] sm:$0xff]  ;;  %v31_v8 = vld [vmem:[%s5200_s0 + $0x40] sm:$0xff] }
  0x12   :  { %2660 = vmatmul.mubr.msk.f32.gmra.mrb[4].mxu1 %vm69_vm1, %v25_v31  ;;  %v4268_v7 = vpack.c.bf16 %v428_v6, %v426_v5  ;;  %v32_v9 = vld [vmem:[%s5200_s0 + $0x48] sm:$0xff]  ;;  %v33_v11 = vld [vmem:[%s5200_s0 + $0x50] sm:$0xff]  ;;  %v34_v12 = vld [vmem:[%s5200_s0 + $0x58] sm:$0xff] }
  0x13   :  { %243 = vmatprep.mubr.f32.mxu1 %v3997_v3  ;;  %2785 = vmatpush1.bf16.msra.mxu1 %v4124_v30  ;;  %v35_v14 = vld [vmem:[%s5200_s0 + $0x60] sm:$0xff]  ;;  %v36_v15 = vld [vmem:[%s5200_s0 + $0x68] sm:$0xff]  ;;  %v37_v16 = vld [vmem:[%s5200_s0 + $0x70] sm:$0xff] }
  0x14   :  { %2787 = vmatprep.subr.bf16.mxu1 %v4131_v32  ;;  %3221 = vmatpush1.bf16.msra.mxu0 %v4149_v37  ;;  %v38_v17 = vld [vmem:[%s5200_s0 + $0x78] sm:$0xff]  ;;  %v39_v19 = vld [vmem:[%s5200_s0 + $0x80] sm:$0xff]  ;;  %v40_v20 = vld [vmem:[%s5200_s0 + $0x88] sm:$0xff] }
  0x15   :  { %3223 = vmatprep.subr.bf16.mxu0 %v4156_v39  ;;  %v41_v21 = vld [vmem:[%s5200_s0 + $0x90] sm:$0xff]  ;;  %v42_v22 = vld [vmem:[%s5200_s0 + $0x98] sm:$0xff]  ;;  %v43_v24 = vld [vmem:[%s5200_s0 + $0xa0] sm:$0xff] }
  0x16   :  { %2661 = vmatmul.mubr.msk.f32.gmra.mrb[6].mxu1 %vm69_vm1, %v26_v38  ;;  %v44_v26 = vld [vmem:[%s5200_s0 + $0xa8] sm:$0xff]  ;;  %v45_v27 = vld [vmem:[%s5200_s0 + $0xb0] sm:$0xff]  ;;  %v4356_v29 = vld [vmem:[%s5199_s2 + $0x120] sm:$0x3f]  ;;  %v59_v38 = vlaneseq }
  0x17   :  { %249 = vmatprep.mubr.f32.mxu1 %v3997_v3  ;;  %2789 = vmatpush1.bf16.msra.mxu1 %v4149_v37  ;;  %v4351_v28 = vld [vmem:[%s5199_s2 + $0x128] sm:$0x3f]  ;;  %v46_v31 = vld [vmem:[%s5200_s0 + $0xb8] sm:$0xff]  ;;  %v47_v33 = vld [vmem:[%s5200_s0 + $0xc0] sm:$0xff] }
  0x18   :  { %2791 = vmatprep.subr.bf16.mxu1 %v4156_v39  ;;  %3225 = vmatpush1.bf16.msra.mxu0 %v4174_v44  ;;  %v48_v34 = vld [vmem:[%s5200_s0 + $0xc8] sm:$0xff]  ;;  %v49_v35 = vld [vmem:[%s5200_s0 + $0xd0] sm:$0xff]  ;;  %v50_v36 = vld [vmem:[%s5200_s0 + $0xd8] sm:$0xff]  ;;  %v60_v40 = vshrl.u32 %v59_v38, 7 }
  0x19   :  { %3227 = vmatprep.subr.bf16.mxu0 %v4181_v46  ;;  %v57_v42 = vld [vmem:[%s5201_s3] sm:$0x3] }
  0x1a   :  { %2662 = vmatmul.mubr.msk.f32.gmra.mrb[8].mxu1 %vm69_vm1, %v27_v45  ;;  %v61_v41 = vsub.s32 0, %v60_v40  ;;  %v65_v43 = vsub.s32 1, %v60_v40 }
  0x1b   :  { %255 = vmatprep.mubr.f32.mxu1 %v3997_v3  ;;  %2793 = vmatpush1.bf16.msra.mxu1 %v4174_v44 }
  0x1c   :  { %2795 = vmatprep.subr.bf16.mxu1 %v4181_v46  ;;  %3229 = vmatpush1.bf16.msra.mxu0 %v4199_v51  ;;  %v4397_v45 = vrot.slane %v57_v42, %v61_v41  ;;  %v4399_v47 = vrot.slane %v57_v42, %v65_v43 }
  0x1d   :  { %3231 = vmatprep.subr.bf16.mxu0 %v4206_v53 }
  0x1e   :  { %2663 = vmatmul.mubr.msk.f32.gmra.mrb[10].mxu1 %vm69_vm1, %v28_v52 }
  0x1f   :  { %261 = vmatprep.mubr.f32.mxu1 %v3997_v3  ;;  %2797 = vmatpush1.bf16.msra.mxu1 %v4199_v51 }
  0x20   :  { %2799 = vmatprep.subr.bf16.mxu1 %v4206_v53  ;;  %3233 = vmatpush1.bf16.msra.mxu0 %v4224_v58 }
  0x21   :  { %3235 = vmatprep.subr.bf16.mxu0 %v4231_v60 }
  0x22   :  { %2664 = vmatmul.mubr.msk.f32.gmra.mrb[12].mxu1 %vm69_vm1, %v29_v59 }
  0x23   :  { %267 = vmatprep.mubr.f32.mxu1 %v3997_v3  ;;  %2801 = vmatpush1.bf16.msra.mxu1 %v4224_v58 }
  0x24   :  { %2803 = vmatprep.subr.bf16.mxu1 %v4231_v60  ;;  %3237 = vmatpush1.bf16.msra.mxu0 %v4249_v1 }
  0x25   :  { %3239 = vmatprep.subr.bf16.mxu0 %v4256_v4 }
  0x26   :  { %2665 = vmatmul.mubr.msk.f32.gmra.mrb[14].mxu1 %vm69_vm1, %v30_v2 }
  0x27   :  { %273 = vmatprep.mubr.f32.mxu1 %v3997_v3  ;;  %2805 = vmatpush1.bf16.msra.mxu1 %v4249_v1 }
  0x28   :  { %2807 = vmatprep.subr.bf16.mxu1 %v4256_v4  ;;  %3241 = vmatpush1.bf16.msra.mxu0 %v4268_v7 }
  0x29   :  { %2722 = vmatprep.subr.msk.mxu0 %vm438_vm2, %v4351_v28 }
  0x2a   :  { %2666 = vmatmul.mubr.msk.f32.gmra.mrb[16].mxu1 %vm69_vm1, %v31_v8 }
  0x2b   :  { %279 = vmatprep.mubr.f32.mxu1 %v3997_v3  ;;  %2809 = vmatpush1.bf16.msra.mxu1 %v4268_v7 }
  0x2c   :  { %2686 = vmatprep.subr.msk.mxu1 %vm438_vm2, %v4351_v28  ;;  %2723 = vmatpush1.msk.msra.mxu0 %vm438_vm2, %v4356_v29 }
  0x2d   :  { %3243 = vmatprep.subr.bf16.mxu0 %v4056_v10 }
  0x2e   :  { %2667 = vmatmul.mubr.msk.f32.gmra.mrb[18].mxu1 %vm69_vm1, %v32_v9 }
  0x2f   :  { %285 = vmatprep.mubr.f32.mxu1 %v3997_v3  ;;  %2687 = vmatpush1.msk.msra.mxu1 %vm438_vm2, %v4356_v29 }
  0x30   :  { %2811 = vmatprep.subr.bf16.mxu1 %v4056_v10 }
  0x32   :  { %2668 = vmatmul.mubr.msk.f32.gmra.mrb[20].mxu1 %vm69_vm1, %v33_v11 }
  0x33   :  { %291 = vmatprep.mubr.f32.mxu1 %v3997_v3 }
  0x36   :  { %2669 = vmatmul.mubr.msk.f32.gmra.mrb[22].mxu1 %vm69_vm1, %v34_v12 }
  0x37   :  { %297 = vmatprep.mubr.f32.mxu1 %v3997_v3 }
  0x3a   :  { %2670 = vmatmul.mubr.msk.f32.gmra.mrb[24].mxu1 %vm69_vm1, %v35_v14 }
  0x3b   :  { %303 = vmatprep.mubr.f32.mxu1 %v3997_v3 }
  0x3e   :  { %2671 = vmatmul.mubr.msk.f32.gmra.mrb[26].mxu1 %vm69_vm1, %v36_v15 }
  0x3f   :  { %309 = vmatprep.mubr.f32.mxu1 %v3997_v3 }
  0x42   :  { %2672 = vmatmul.mubr.msk.f32.gmra.mrb[28].mxu1 %vm69_vm1, %v37_v16 }
  0x43   :  { %315 = vmatprep.mubr.f32.mxu1 %v3997_v3 }
  0x46   :  { %2673 = vmatmul.mubr.msk.f32.gmra.mrb[30].mxu1 %vm69_vm1, %v38_v17 }
  0x47   :  { %321 = vmatprep.mubr.f32.mxu1 %v3997_v3 }
  0x4a   :  { %2674 = vmatmul.mubr.msk.f32.gmra.mrb[32].mxu1 %vm69_vm1, %v39_v19 }
  0x4b   :  { %327 = vmatprep.mubr.f32.mxu1 %v3997_v3 }
  0x4e   :  { %2675 = vmatmul.mubr.msk.f32.gmra.mrb[34].mxu1 %vm69_vm1, %v40_v20 }
  0x4f   :  { %333 = vmatprep.mubr.f32.mxu1 %v3997_v3 }
  0x52   :  { %2676 = vmatmul.mubr.msk.f32.gmra.mrb[36].mxu1 %vm69_vm1, %v41_v21 }
  0x53   :  { %339 = vmatprep.mubr.f32.mxu1 %v3997_v3 }
  0x56   :  { %2677 = vmatmul.mubr.msk.f32.gmra.mrb[38].mxu1 %vm69_vm1, %v42_v22 }
  0x57   :  { %345 = vmatprep.mubr.f32.mxu1 %v3997_v3 }
  0x5a   :  { %2678 = vmatmul.mubr.msk.f32.gmra.mrb[40].mxu1 %vm69_vm1, %v43_v24 }
  0x5b   :  { %351 = vmatprep.mubr.f32.mxu1 %v3997_v3 }
  0x5e   :  { %2679 = vmatmul.mubr.msk.f32.gmra.mrb[42].mxu1 %vm69_vm1, %v44_v26 }
  0x5f   :  { %357 = vmatprep.mubr.f32.mxu1 %v3997_v3 }
  0x62   :  { %2680 = vmatmul.mubr.msk.f32.gmra.mrb[44].mxu1 %vm69_vm1, %v45_v27 }
  0x63   :  { %363 = vmatprep.mubr.f32.mxu1 %v3997_v3 }
  0x66   :  { %2681 = vmatmul.mubr.msk.f32.gmra.mrb[46].mxu1 %vm69_vm1, %v46_v31 }
  0x67   :  { %369 = vmatprep.mubr.f32.mxu1 %v3997_v3 }
  0x6a   :  { %2682 = vmatmul.mubr.msk.f32.gmra.mrb[48].mxu1 %vm69_vm1, %v47_v33 }
  0x6b   :  { %375 = vmatprep.mubr.f32.mxu1 %v3997_v3 }
  0x6e   :  { %2683 = vmatmul.mubr.msk.f32.gmra.mrb[50].mxu1 %vm69_vm1, %v48_v34 }
  0x6f   :  { %381 = vmatprep.mubr.f32.mxu1 %v3997_v3 }
  0x72   :  { %2684 = vmatmul.mubr.msk.f32.gmra.mrb[52].mxu1 %vm69_vm1, %v49_v35 }
  0x73   :  { %387 = vmatprep.mubr.f32.mxu1 %v3997_v3 }
  0x76   :  { %2685 = vmatmul.mubr.msk.f32.gmra.mrb[54].mxu1 %vm69_vm1, %v50_v36 }
  0xdd   :  { %v227_v48 = vpop.f32.mrb[0].mxu1 }
  0xde   :  { %v228_v49 = vadd.f32 %v227_v48, %v4397_v45  ;;  %v229_v50 = vpop.f32.mrb[1].mxu1 }
  0xdf   :  { %v230_v52 = vadd.f32 %v229_v50, %v4399_v47 }
  0xe1   :  { %3883 = vtanh.f32 %v230_v52 }
  0xe2   :  { %3885 = vtanh.f32 %v228_v49 }
  0xeb   :  { %v3884_v54 = vpop.eup %3883 }
  0xec   :  { %v3886_v55 = vpop.eup %3885  ;;  %2688 = vmatprep.mubr.msk.f32.mxu1 %vm434_vm3, %v3884_v54 }
  0xed   :  { %510 = vmatmul.mubr.f32.vlgmr.msra.gmra.mrb[2].mxu1 %v3886_v55 }
  0xee   :  { %2813 = vmatpush1.bf16.msra.mxu1 %v4064_v13 }
  0xef   :  { %2815 = vmatprep.subr.bf16.mxu1 %v4080_v18 }
  0xf2   :  { %2817 = vmatpush1.bf16.msra.mxu1 %v4099_v23 }
  0xf3   :  { %2819 = vmatprep.subr.bf16.mxu1 %v4106_v25 }
  0xf6   :  { %2821 = vmatpush1.bf16.msra.mxu1 %v4124_v30 }
  0xf7   :  { %2823 = vmatprep.subr.bf16.mxu1 %v4131_v32 }
  0xfa   :  { %2825 = vmatpush1.bf16.msra.mxu1 %v4149_v37 }
  0xfb   :  { %2827 = vmatprep.subr.bf16.mxu1 %v4156_v39 }
  0xfe   :  { %2829 = vmatpush1.bf16.msra.mxu1 %v4174_v44 }
  0xff   :  { %2831 = vmatprep.subr.bf16.mxu1 %v4181_v46 }
 0x102   :  { %2833 = vmatpush1.bf16.msra.mxu1 %v4199_v51 }
 0x103   :  { %2835 = vmatprep.subr.bf16.mxu1 %v4206_v53 }
 0x106   :  { %2837 = vmatpush1.bf16.msra.mxu1 %v4224_v58 }
 0x107   :  { %2839 = vmatprep.subr.bf16.mxu1 %v4231_v60 }
 0x10a   :  { %2841 = vmatpush1.bf16.msra.mxu1 %v4249_v1 }
 0x10b   :  { %2843 = vmatprep.subr.bf16.mxu1 %v4256_v4 }
 0x10e   :  { %2845 = vmatpush1.bf16.msra.mxu1 %v4268_v7 }
 0x10f   :  { %2689 = vmatprep.subr.msk.mxu1 %vm438_vm2, %v4351_v28 }
 0x111   :  { %v4423_v56 = vpop.f32.mrb[26].mxu1 }
 0x112   :  { %v4425_v57 = vpop.f32.mrb[27].mxu1  ;;  %2690 = vmatpush1.msk.msra.mxu1 %vm438_vm2, %v4356_v29 }
 0x113   :  { %2847 = vmatprep.subr.bf16.mxu1 %v4056_v10 }
 0x115   :  { %v4430_v59 = vpop.f32.mrb[28].mxu1 }
 0x116   :  { %v4432_v61 = vpop.f32.mrb[29].mxu1 }
 0x119   :  { %v4434_v62 = vpop.f32.mrb[30].mxu1 }
 0x11a   :  { %v4436_v63 = vpop.f32.mrb[31].mxu1 }
 0x11d   :  { %v4438_v0 = vpop.f32.mrb[32].mxu1 }
 0x11e   :  { %v4440_v2 = vpop.f32.mrb[33].mxu1 }
 0x121   :  { %v4442_v5 = vpop.f32.mrb[34].mxu1 }
 0x122   :  { %v4444_v6 = vpop.f32.mrb[35].mxu1 }
 0x125   :  { %v4446_v8 = vpop.f32.mrb[36].mxu1 }
 0x126   :  { %v4448_v9 = vpop.f32.mrb[37].mxu1 }
 0x129   :  { %v4450_v11 = vpop.f32.mrb[38].mxu1 }
 0x12a   :  { %v4452_v12 = vpop.f32.mrb[39].mxu1 }
 0x12d   :  { %v4454_v14 = vpop.f32.mrb[40].mxu1 }
 0x12e   :  { %v4456_v15 = vpop.f32.mrb[41].mxu1 }
 0x131   :  { %v4458_v16 = vpop.f32.mrb[42].mxu1 }
 0x132   :  { %v4460_v17 = vpop.f32.mrb[43].mxu1 }
 0x135   :  { %v4462_v19 = vpop.f32.mrb[44].mxu1 }
 0x136   :  { %v4464_v20 = vpop.f32.mrb[45].mxu1 }
 0x139   :  { %v4466_v21 = vpop.f32.mrb[46].mxu1 }
 0x13a   :  { %v4468_v22 = vpop.f32.mrb[47].mxu1 }
 0x13d   :  { %v4470_v24 = vpop.f32.mrb[48].mxu1 }
 0x13e   :  { %v4472_v26 = vpop.f32.mrb[49].mxu1 }
 0x141   :  { %v4474_v27 = vpop.f32.mrb[50].mxu1 }
 0x142   :  { %v4476_v31 = vpop.f32.mrb[51].mxu1 }
 0x145   :  { %v4478_v33 = vpop.f32.mrb[52].mxu1 }
 0x146   :  { %v4480_v34 = vpop.f32.mrb[53].mxu1 }
 0x149   :  { %v4482_v35 = vpop.f32.mrb[54].mxu1 }
 0x14a   :  { %v4484_v36 = vpop.f32.mrb[55].mxu1 }
 0x1c0   :  { %v511_v38 = vpop.f32.mrb[2].mxu1 }
 0x1c1   :  { %v3773_v40 = vadd.f32 %v511_v38, %v4397_v45  ;;  %v513_v41 = vpop.f32.mrb[3].mxu1 }
 0x1c2   :  { %v3774_v42 = vadd.f32 %v513_v41, %v4399_v47 }
 0x1c4   :  { %3887 = vtanh.f32 %v3774_v42 }
 0x1c5   :  { %3889 = vtanh.f32 %v3773_v40 }
 0x1ce   :  { %v3888_v43 = vpop.eup %3887 }
 0x1cf   :  { %v3890_v48 = vpop.eup %3889  ;;  %2691 = vmatprep.mubr.msk.f32.mxu1 %vm434_vm3, %v3888_v43 }
 0x1d0   :  { %588 = vmatmul.mubr.f32.vlgmr.msra.gmra.mrb[4].mxu1 %v3890_v48 }
 0x1d1   :  { %2849 = vmatpush1.bf16.msra.mxu1 %v4064_v13 }
 0x1d2   :  { %2851 = vmatprep.subr.bf16.mxu1 %v4080_v18 }
 0x1d5   :  { %2853 = vmatpush1.bf16.msra.mxu1 %v4099_v23 }
 0x1d6   :  { %2855 = vmatprep.subr.bf16.mxu1 %v4106_v25 }
 0x1d9   :  { %2857 = vmatpush1.bf16.msra.mxu1 %v4124_v30 }
 0x1da   :  { %2859 = vmatprep.subr.bf16.mxu1 %v4131_v32 }
 0x1dd   :  { %2861 = vmatpush1.bf16.msra.mxu1 %v4149_v37 }
 0x1de   :  { %2863 = vmatprep.subr.bf16.mxu1 %v4156_v39 }
 0x1e1   :  { %2865 = vmatpush1.bf16.msra.mxu1 %v4174_v44 }
 0x1e2   :  { %2867 = vmatprep.subr.bf16.mxu1 %v4181_v46 }
 0x1e5   :  { %2869 = vmatpush1.bf16.msra.mxu1 %v4199_v51 }
 0x1e6   :  { %2871 = vmatprep.subr.bf16.mxu1 %v4206_v53 }
 0x1e9   :  { %2873 = vmatpush1.bf16.msra.mxu1 %v4224_v58 }
 0x1ea   :  { %2875 = vmatprep.subr.bf16.mxu1 %v4231_v60 }
 0x1ed   :  { %2877 = vmatpush1.bf16.msra.mxu1 %v4249_v1 }
 0x1ee   :  { %2879 = vmatprep.subr.bf16.mxu1 %v4256_v4 }
 0x1f1   :  { %2881 = vmatpush1.bf16.msra.mxu1 %v4268_v7 }
 0x1f2   :  { %2692 = vmatprep.subr.msk.mxu1 %vm438_vm2, %v4351_v28 }
 0x1f5   :  { %2693 = vmatpush1.msk.msra.mxu1 %vm438_vm2, %v4356_v29 }
 0x1f6   :  { %2883 = vmatprep.subr.bf16.mxu1 %v4056_v10 }
 0x2a3   :  { %v589_v49 = vpop.f32.mrb[4].mxu1 }
 0x2a4   :  { %v3775_v50 = vadd.f32 %v589_v49, %v4397_v45  ;;  %v591_v52 = vpop.f32.mrb[5].mxu1 }
 0x2a5   :  { %v3776_v54 = vadd.f32 %v591_v52, %v4399_v47 }
 0x2a7   :  { %3891 = vtanh.f32 %v3776_v54 }
 0x2a8   :  { %3893 = vtanh.f32 %v3775_v50 }
 0x2b1   :  { %v3892_v55 = vpop.eup %3891 }
 0x2b2   :  { %v3894_v38 = vpop.eup %3893  ;;  %2694 = vmatprep.mubr.msk.f32.mxu1 %vm434_vm3, %v3892_v55 }
 0x2b3   :  { %666 = vmatmul.mubr.f32.vlgmr.msra.gmra.mrb[6].mxu1 %v3894_v38 }
 0x2b4   :  { %2885 = vmatpush1.bf16.msra.mxu1 %v4064_v13 }
 0x2b5   :  { %2887 = vmatprep.subr.bf16.mxu1 %v4080_v18 }
 0x2b8   :  { %2889 = vmatpush1.bf16.msra.mxu1 %v4099_v23 }
 0x2b9   :  { %2891 = vmatprep.subr.bf16.mxu1 %v4106_v25 }
 0x2bc   :  { %2893 = vmatpush1.bf16.msra.mxu1 %v4124_v30 }
 0x2bd   :  { %2895 = vmatprep.subr.bf16.mxu1 %v4131_v32 }
 0x2c0   :  { %2897 = vmatpush1.bf16.msra.mxu1 %v4149_v37 }
 0x2c1   :  { %2899 = vmatprep.subr.bf16.mxu1 %v4156_v39 }
 0x2c4   :  { %2901 = vmatpush1.bf16.msra.mxu1 %v4174_v44 }
 0x2c5   :  { %2903 = vmatprep.subr.bf16.mxu1 %v4181_v46 }
 0x2c8   :  { %2905 = vmatpush1.bf16.msra.mxu1 %v4199_v51 }
 0x2c9   :  { %2907 = vmatprep.subr.bf16.mxu1 %v4206_v53 }
 0x2cc   :  { %2909 = vmatpush1.bf16.msra.mxu1 %v4224_v58 }
 0x2cd   :  { %2911 = vmatprep.subr.bf16.mxu1 %v4231_v60 }
 0x2d0   :  { %2913 = vmatpush1.bf16.msra.mxu1 %v4249_v1 }
 0x2d1   :  { %2915 = vmatprep.subr.bf16.mxu1 %v4256_v4 }
 0x2d4   :  { %2917 = vmatpush1.bf16.msra.mxu1 %v4268_v7 }
 0x2d5   :  { %2695 = vmatprep.subr.msk.mxu1 %vm438_vm2, %v4351_v28 }
 0x2d8   :  { %2696 = vmatpush1.msk.msra.mxu1 %vm438_vm2, %v4356_v29 }
 0x2d9   :  { %2919 = vmatprep.subr.bf16.mxu1 %v4056_v10 }
 0x386   :  { %v667_v40 = vpop.f32.mrb[6].mxu1 }
 0x387   :  { %v3777_v41 = vadd.f32 %v667_v40, %v4397_v45  ;;  %v669_v42 = vpop.f32.mrb[7].mxu1 }
 0x388   :  { %v3778_v43 = vadd.f32 %v669_v42, %v4399_v47 }
 0x38a   :  { %3895 = vtanh.f32 %v3778_v43 }
 0x38b   :  { %3897 = vtanh.f32 %v3777_v41 }
 0x394   :  { %v3896_v48 = vpop.eup %3895 }
 0x395   :  { %v3898_v49 = vpop.eup %3897  ;;  %2697 = vmatprep.mubr.msk.f32.mxu1 %vm434_vm3, %v3896_v48 }
 0x396   :  { %744 = vmatmul.mubr.f32.vlgmr.msra.gmra.mrb[8].mxu1 %v3898_v49 }
 0x397   :  { %2921 = vmatpush1.bf16.msra.mxu1 %v4064_v13 }
 0x398   :  { %2923 = vmatprep.subr.bf16.mxu1 %v4080_v18 }
 0x39b   :  { %2925 = vmatpush1.bf16.msra.mxu1 %v4099_v23 }
 0x39c   :  { %2927 = vmatprep.subr.bf16.mxu1 %v4106_v25 }
 0x39f   :  { %2929 = vmatpush1.bf16.msra.mxu1 %v4124_v30 }
 0x3a0   :  { %2931 = vmatprep.subr.bf16.mxu1 %v4131_v32 }
 0x3a3   :  { %2933 = vmatpush1.bf16.msra.mxu1 %v4149_v37 }
 0x3a4   :  { %2935 = vmatprep.subr.bf16.mxu1 %v4156_v39 }
 0x3a7   :  { %2937 = vmatpush1.bf16.msra.mxu1 %v4174_v44 }
 0x3a8   :  { %2939 = vmatprep.subr.bf16.mxu1 %v4181_v46 }
 0x3ab   :  { %2941 = vmatpush1.bf16.msra.mxu1 %v4199_v51 }
 0x3ac   :  { %2943 = vmatprep.subr.bf16.mxu1 %v4206_v53 }
 0x3af   :  { %2945 = vmatpush1.bf16.msra.mxu1 %v4224_v58 }
 0x3b0   :  { %2947 = vmatprep.subr.bf16.mxu1 %v4231_v60 }
 0x3b3   :  { %2949 = vmatpush1.bf16.msra.mxu1 %v4249_v1 }
 0x3b4   :  { %2951 = vmatprep.subr.bf16.mxu1 %v4256_v4 }
 0x3b7   :  { %2953 = vmatpush1.bf16.msra.mxu1 %v4268_v7 }
 0x3b8   :  { %2698 = vmatprep.subr.msk.mxu1 %vm438_vm2, %v4351_v28 }
 0x3bb   :  { %2699 = vmatpush1.msk.msra.mxu1 %vm438_vm2, %v4356_v29 }
 0x3bc   :  { %2955 = vmatprep.subr.bf16.mxu1 %v4056_v10 }
 0x469   :  { %v745_v50 = vpop.f32.mrb[8].mxu1 }
 0x46a   :  { %v3779_v52 = vadd.f32 %v745_v50, %v4397_v45  ;;  %v747_v54 = vpop.f32.mrb[9].mxu1 }
 0x46b   :  { %v3780_v55 = vadd.f32 %v747_v54, %v4399_v47 }
 0x46d   :  { %3899 = vtanh.f32 %v3780_v55 }
 0x46e   :  { %3901 = vtanh.f32 %v3779_v52 }
 0x477   :  { %v3900_v38 = vpop.eup %3899 }
 0x478   :  { %v3902_v40 = vpop.eup %3901  ;;  %2700 = vmatprep.mubr.msk.f32.mxu1 %vm434_vm3, %v3900_v38 }
 0x479   :  { %822 = vmatmul.mubr.f32.vlgmr.msra.gmra.mrb[10].mxu1 %v3902_v40 }
 0x47a   :  { %2957 = vmatpush1.bf16.msra.mxu1 %v4064_v13 }
 0x47b   :  { %2959 = vmatprep.subr.bf16.mxu1 %v4080_v18 }
 0x47e   :  { %2961 = vmatpush1.bf16.msra.mxu1 %v4099_v23 }
 0x47f   :  { %2963 = vmatprep.subr.bf16.mxu1 %v4106_v25 }
 0x482   :  { %2965 = vmatpush1.bf16.msra.mxu1 %v4124_v30 }
 0x483   :  { %2967 = vmatprep.subr.bf16.mxu1 %v4131_v32 }
 0x486   :  { %2969 = vmatpush1.bf16.msra.mxu1 %v4149_v37 }
 0x487   :  { %2971 = vmatprep.subr.bf16.mxu1 %v4156_v39 }
 0x48a   :  { %2973 = vmatpush1.bf16.msra.mxu1 %v4174_v44 }
 0x48b   :  { %2975 = vmatprep.subr.bf16.mxu1 %v4181_v46 }
 0x48e   :  { %2977 = vmatpush1.bf16.msra.mxu1 %v4199_v51 }
 0x48f   :  { %2979 = vmatprep.subr.bf16.mxu1 %v4206_v53 }
 0x492   :  { %2981 = vmatpush1.bf16.msra.mxu1 %v4224_v58 }
 0x493   :  { %2983 = vmatprep.subr.bf16.mxu1 %v4231_v60 }
 0x496   :  { %2985 = vmatpush1.bf16.msra.mxu1 %v4249_v1 }
 0x497   :  { %2987 = vmatprep.subr.bf16.mxu1 %v4256_v4 }
 0x49a   :  { %2989 = vmatpush1.bf16.msra.mxu1 %v4268_v7 }
 0x49b   :  { %2701 = vmatprep.subr.msk.mxu1 %vm438_vm2, %v4351_v28 }
 0x49e   :  { %2702 = vmatpush1.msk.msra.mxu1 %vm438_vm2, %v4356_v29 }
 0x49f   :  { %2991 = vmatprep.subr.bf16.mxu1 %v4056_v10 }
 0x54c   :  { %v823_v41 = vpop.f32.mrb[10].mxu1 }
 0x54d   :  { %v3781_v42 = vadd.f32 %v823_v41, %v4397_v45  ;;  %v825_v43 = vpop.f32.mrb[11].mxu1 }
 0x54e   :  { %v3782_v48 = vadd.f32 %v825_v43, %v4399_v47 }
 0x550   :  { %3903 = vtanh.f32 %v3782_v48 }
 0x551   :  { %3905 = vtanh.f32 %v3781_v42 }
 0x55a   :  { %v3904_v49 = vpop.eup %3903 }
 0x55b   :  { %v3906_v50 = vpop.eup %3905  ;;  %2703 = vmatprep.mubr.msk.f32.mxu1 %vm434_vm3, %v3904_v49 }
 0x55c   :  { %900 = vmatmul.mubr.f32.vlgmr.msra.gmra.mrb[12].mxu1 %v3906_v50 }
 0x55d   :  { %2993 = vmatpush1.bf16.msra.mxu1 %v4064_v13 }
 0x55e   :  { %2995 = vmatprep.subr.bf16.mxu1 %v4080_v18 }
 0x561   :  { %2997 = vmatpush1.bf16.msra.mxu1 %v4099_v23 }
 0x562   :  { %2999 = vmatprep.subr.bf16.mxu1 %v4106_v25 }
 0x565   :  { %3001 = vmatpush1.bf16.msra.mxu1 %v4124_v30 }
 0x566   :  { %3003 = vmatprep.subr.bf16.mxu1 %v4131_v32 }
 0x569   :  { %3005 = vmatpush1.bf16.msra.mxu1 %v4149_v37 }
 0x56a   :  { %3007 = vmatprep.subr.bf16.mxu1 %v4156_v39 }
 0x56d   :  { %3009 = vmatpush1.bf16.msra.mxu1 %v4174_v44 }
 0x56e   :  { %3011 = vmatprep.subr.bf16.mxu1 %v4181_v46 }
 0x571   :  { %3013 = vmatpush1.bf16.msra.mxu1 %v4199_v51 }
 0x572   :  { %3015 = vmatprep.subr.bf16.mxu1 %v4206_v53 }
 0x575   :  { %3017 = vmatpush1.bf16.msra.mxu1 %v4224_v58 }
 0x576   :  { %3019 = vmatprep.subr.bf16.mxu1 %v4231_v60 }
 0x579   :  { %3021 = vmatpush1.bf16.msra.mxu1 %v4249_v1 }
 0x57a   :  { %3023 = vmatprep.subr.bf16.mxu1 %v4256_v4 }
 0x57d   :  { %3025 = vmatpush1.bf16.msra.mxu1 %v4268_v7 }
 0x57e   :  { %2704 = vmatprep.subr.msk.mxu1 %vm438_vm2, %v4351_v28 }
 0x581   :  { %2705 = vmatpush1.msk.msra.mxu1 %vm438_vm2, %v4356_v29 }
 0x582   :  { %3027 = vmatprep.subr.bf16.mxu1 %v4056_v10 }
 0x62f   :  { %v901_v52 = vpop.f32.mrb[12].mxu1 }
 0x630   :  { %v3783_v54 = vadd.f32 %v901_v52, %v4397_v45  ;;  %v903_v55 = vpop.f32.mrb[13].mxu1 }
 0x631   :  { %v3784_v38 = vadd.f32 %v903_v55, %v4399_v47 }
 0x633   :  { %3907 = vtanh.f32 %v3784_v38 }
 0x634   :  { %3909 = vtanh.f32 %v3783_v54 }
 0x63d   :  { %v3908_v40 = vpop.eup %3907 }
 0x63e   :  { %v3910_v41 = vpop.eup %3909  ;;  %2706 = vmatprep.mubr.msk.f32.mxu1 %vm434_vm3, %v3908_v40 }
 0x63f   :  { %978 = vmatmul.mubr.f32.vlgmr.msra.gmra.mrb[14].mxu1 %v3910_v41 }
 0x640   :  { %3029 = vmatpush1.bf16.msra.mxu1 %v4064_v13 }
 0x641   :  { %3031 = vmatprep.subr.bf16.mxu1 %v4080_v18 }
 0x644   :  { %3033 = vmatpush1.bf16.msra.mxu1 %v4099_v23 }
 0x645   :  { %3035 = vmatprep.subr.bf16.mxu1 %v4106_v25 }
 0x648   :  { %3037 = vmatpush1.bf16.msra.mxu1 %v4124_v30 }
 0x649   :  { %3039 = vmatprep.subr.bf16.mxu1 %v4131_v32 }
 0x64c   :  { %3041 = vmatpush1.bf16.msra.mxu1 %v4149_v37 }
 0x64d   :  { %3043 = vmatprep.subr.bf16.mxu1 %v4156_v39 }
 0x650   :  { %3045 = vmatpush1.bf16.msra.mxu1 %v4174_v44 }
 0x651   :  { %3047 = vmatprep.subr.bf16.mxu1 %v4181_v46 }
 0x654   :  { %3049 = vmatpush1.bf16.msra.mxu1 %v4199_v51 }
 0x655   :  { %3051 = vmatprep.subr.bf16.mxu1 %v4206_v53 }
 0x658   :  { %3053 = vmatpush1.bf16.msra.mxu1 %v4224_v58 }
 0x659   :  { %3055 = vmatprep.subr.bf16.mxu1 %v4231_v60 }
 0x65c   :  { %3057 = vmatpush1.bf16.msra.mxu1 %v4249_v1 }
 0x65d   :  { %3059 = vmatprep.subr.bf16.mxu1 %v4256_v4 }
 0x660   :  { %3061 = vmatpush1.bf16.msra.mxu1 %v4268_v7 }
 0x661   :  { %2707 = vmatprep.subr.msk.mxu1 %vm438_vm2, %v4351_v28 }
 0x664   :  { %2708 = vmatpush1.msk.msra.mxu1 %vm438_vm2, %v4356_v29 }
 0x665   :  { %3063 = vmatprep.subr.bf16.mxu1 %v4056_v10 }
 0x712   :  { %v979_v42 = vpop.f32.mrb[14].mxu1 }
 0x713   :  { %v3785_v43 = vadd.f32 %v979_v42, %v4397_v45  ;;  %v981_v48 = vpop.f32.mrb[15].mxu1 }
 0x714   :  { %v3786_v49 = vadd.f32 %v981_v48, %v4399_v47 }
 0x716   :  { %3911 = vtanh.f32 %v3786_v49 }
 0x717   :  { %3913 = vtanh.f32 %v3785_v43 }
 0x720   :  { %v3912_v50 = vpop.eup %3911 }
 0x721   :  { %v3914_v52 = vpop.eup %3913  ;;  %2709 = vmatprep.mubr.msk.f32.mxu1 %vm434_vm3, %v3912_v50 }
 0x722   :  { %1056 = vmatmul.mubr.f32.vlgmr.msra.gmra.mrb[16].mxu1 %v3914_v52 }
 0x723   :  { %3065 = vmatpush1.bf16.msra.mxu1 %v4064_v13 }
 0x724   :  { %3067 = vmatprep.subr.bf16.mxu1 %v4080_v18 }
 0x727   :  { %3069 = vmatpush1.bf16.msra.mxu1 %v4099_v23 }
 0x728   :  { %3071 = vmatprep.subr.bf16.mxu1 %v4106_v25 }
 0x72b   :  { %3073 = vmatpush1.bf16.msra.mxu1 %v4124_v30 }
 0x72c   :  { %3075 = vmatprep.subr.bf16.mxu1 %v4131_v32 }
 0x72f   :  { %3077 = vmatpush1.bf16.msra.mxu1 %v4149_v37 }
 0x730   :  { %3079 = vmatprep.subr.bf16.mxu1 %v4156_v39 }
 0x733   :  { %3081 = vmatpush1.bf16.msra.mxu1 %v4174_v44 }
 0x734   :  { %3083 = vmatprep.subr.bf16.mxu1 %v4181_v46 }
 0x737   :  { %3085 = vmatpush1.bf16.msra.mxu1 %v4199_v51 }
 0x738   :  { %3087 = vmatprep.subr.bf16.mxu1 %v4206_v53 }
 0x73b   :  { %3089 = vmatpush1.bf16.msra.mxu1 %v4224_v58 }
 0x73c   :  { %3091 = vmatprep.subr.bf16.mxu1 %v4231_v60 }
 0x73f   :  { %3093 = vmatpush1.bf16.msra.mxu1 %v4249_v1 }
 0x740   :  { %3095 = vmatprep.subr.bf16.mxu1 %v4256_v4 }
 0x743   :  { %3097 = vmatpush1.bf16.msra.mxu1 %v4268_v7 }
 0x744   :  { %2710 = vmatprep.subr.msk.mxu1 %vm438_vm2, %v4351_v28 }
 0x747   :  { %2711 = vmatpush1.msk.msra.mxu1 %vm438_vm2, %v4356_v29 }
 0x748   :  { %3099 = vmatprep.subr.bf16.mxu1 %v4056_v10 }
 0x7f5   :  { %v1057_v54 = vpop.f32.mrb[16].mxu1 }
 0x7f6   :  { %v3787_v55 = vadd.f32 %v1057_v54, %v4397_v45  ;;  %v1059_v38 = vpop.f32.mrb[17].mxu1 }
 0x7f7   :  { %v3788_v40 = vadd.f32 %v1059_v38, %v4399_v47 }
 0x7f9   :  { %3915 = vtanh.f32 %v3788_v40 }
 0x7fa   :  { %3917 = vtanh.f32 %v3787_v55 }
 0x803   :  { %v3916_v41 = vpop.eup %3915 }
 0x804   :  { %v3918_v42 = vpop.eup %3917  ;;  %2712 = vmatprep.mubr.msk.f32.mxu1 %vm434_vm3, %v3916_v41 }
 0x805   :  { %1134 = vmatmul.mubr.f32.vlgmr.msra.gmra.mrb[18].mxu1 %v3918_v42 }
 0x806   :  { %3101 = vmatpush1.bf16.msra.mxu1 %v4064_v13 }
 0x807   :  { %3103 = vmatprep.subr.bf16.mxu1 %v4080_v18 }
 0x80a   :  { %3105 = vmatpush1.bf16.msra.mxu1 %v4099_v23 }
 0x80b   :  { %3107 = vmatprep.subr.bf16.mxu1 %v4106_v25 }
 0x80e   :  { %3109 = vmatpush1.bf16.msra.mxu1 %v4124_v30 }
 0x80f   :  { %3111 = vmatprep.subr.bf16.mxu1 %v4131_v32 }
 0x812   :  { %3113 = vmatpush1.bf16.msra.mxu1 %v4149_v37 }
 0x813   :  { %3115 = vmatprep.subr.bf16.mxu1 %v4156_v39 }
 0x816   :  { %3117 = vmatpush1.bf16.msra.mxu1 %v4174_v44 }
 0x817   :  { %3119 = vmatprep.subr.bf16.mxu1 %v4181_v46 }
 0x81a   :  { %3121 = vmatpush1.bf16.msra.mxu1 %v4199_v51 }
 0x81b   :  { %3123 = vmatprep.subr.bf16.mxu1 %v4206_v53 }
 0x81e   :  { %3125 = vmatpush1.bf16.msra.mxu1 %v4224_v58 }
 0x81f   :  { %3127 = vmatprep.subr.bf16.mxu1 %v4231_v60 }
 0x822   :  { %3129 = vmatpush1.bf16.msra.mxu1 %v4249_v1 }
 0x823   :  { %3131 = vmatprep.subr.bf16.mxu1 %v4256_v4 }
 0x826   :  { %3133 = vmatpush1.bf16.msra.mxu1 %v4268_v7 }
 0x827   :  { %2713 = vmatprep.subr.msk.mxu1 %vm438_vm2, %v4351_v28 }
 0x82a   :  { %2714 = vmatpush1.msk.msra.mxu1 %vm438_vm2, %v4356_v29 }
 0x82b   :  { %3135 = vmatprep.subr.bf16.mxu1 %v4056_v10 }
 0x8d8   :  { %v1135_v43 = vpop.f32.mrb[18].mxu1 }
 0x8d9   :  { %v3789_v48 = vadd.f32 %v1135_v43, %v4397_v45  ;;  %v1137_v49 = vpop.f32.mrb[19].mxu1 }
 0x8da   :  { %v3790_v50 = vadd.f32 %v1137_v49, %v4399_v47 }
 0x8dc   :  { %3919 = vtanh.f32 %v3790_v50 }
 0x8dd   :  { %3921 = vtanh.f32 %v3789_v48 }
 0x8e6   :  { %v3920_v52 = vpop.eup %3919 }
 0x8e7   :  { %v3922_v54 = vpop.eup %3921  ;;  %2715 = vmatprep.mubr.msk.f32.mxu1 %vm434_vm3, %v3920_v52 }
 0x8e8   :  { %1212 = vmatmul.mubr.f32.vlgmr.msra.gmra.mrb[20].mxu1 %v3922_v54 }
 0x8e9   :  { %3137 = vmatpush1.bf16.msra.mxu1 %v4064_v13 }
 0x8ea   :  { %3139 = vmatprep.subr.bf16.mxu1 %v4080_v18 }
 0x8ed   :  { %3141 = vmatpush1.bf16.msra.mxu1 %v4099_v23 }
 0x8ee   :  { %3143 = vmatprep.subr.bf16.mxu1 %v4106_v25 }
 0x8f1   :  { %3145 = vmatpush1.bf16.msra.mxu1 %v4124_v30 }
 0x8f2   :  { %3147 = vmatprep.subr.bf16.mxu1 %v4131_v32 }
 0x8f5   :  { %3149 = vmatpush1.bf16.msra.mxu1 %v4149_v37 }
 0x8f6   :  { %3151 = vmatprep.subr.bf16.mxu1 %v4156_v39 }
 0x8f9   :  { %3153 = vmatpush1.bf16.msra.mxu1 %v4174_v44 }
 0x8fa   :  { %3155 = vmatprep.subr.bf16.mxu1 %v4181_v46 }
 0x8fd   :  { %3157 = vmatpush1.bf16.msra.mxu1 %v4199_v51 }
 0x8fe   :  { %3159 = vmatprep.subr.bf16.mxu1 %v4206_v53 }
 0x901   :  { %3161 = vmatpush1.bf16.msra.mxu1 %v4224_v58 }
 0x902   :  { %3163 = vmatprep.subr.bf16.mxu1 %v4231_v60 }
 0x905   :  { %3165 = vmatpush1.bf16.msra.mxu1 %v4249_v1 }
 0x906   :  { %3167 = vmatprep.subr.bf16.mxu1 %v4256_v4 }
 0x909   :  { %3169 = vmatpush1.bf16.msra.mxu1 %v4268_v7 }
 0x90a   :  { %2716 = vmatprep.subr.msk.mxu1 %vm438_vm2, %v4351_v28 }
 0x90d   :  { %2717 = vmatpush1.msk.msra.mxu1 %vm438_vm2, %v4356_v29 }
 0x90e   :  { %3171 = vmatprep.subr.bf16.mxu1 %v4056_v10 }
 0x9bb   :  { %v1213_v55 = vpop.f32.mrb[20].mxu1 }
 0x9bc   :  { %v3791_v38 = vadd.f32 %v1213_v55, %v4397_v45  ;;  %v1215_v40 = vpop.f32.mrb[21].mxu1 }
 0x9bd   :  { %v3792_v41 = vadd.f32 %v1215_v40, %v4399_v47 }
 0x9bf   :  { %3923 = vtanh.f32 %v3792_v41 }
 0x9c0   :  { %3925 = vtanh.f32 %v3791_v38 }
 0x9c9   :  { %v3924_v42 = vpop.eup %3923 }
 0x9ca   :  { %v3926_v43 = vpop.eup %3925  ;;  %2718 = vmatprep.mubr.msk.f32.mxu1 %vm434_vm3, %v3924_v42 }
 0x9cb   :  { %1290 = vmatmul.mubr.f32.vlgmr.msra.gmra.mrb[22].mxu1 %v3926_v43 }
 0x9cc   :  { %3173 = vmatpush1.bf16.msra.mxu1 %v4064_v13 }
 0x9cd   :  { %3175 = vmatprep.subr.bf16.mxu1 %v4080_v18 }
 0x9d0   :  { %3177 = vmatpush1.bf16.msra.mxu1 %v4099_v23 }
 0x9d1   :  { %3179 = vmatprep.subr.bf16.mxu1 %v4106_v25 }
 0x9d4   :  { %3181 = vmatpush1.bf16.msra.mxu1 %v4124_v30 }
 0x9d5   :  { %3183 = vmatprep.subr.bf16.mxu1 %v4131_v32 }
 0x9d8   :  { %3185 = vmatpush1.bf16.msra.mxu1 %v4149_v37 }
 0x9d9   :  { %3187 = vmatprep.subr.bf16.mxu1 %v4156_v39 }
 0x9dc   :  { %3189 = vmatpush1.bf16.msra.mxu1 %v4174_v44 }
 0x9dd   :  { %3191 = vmatprep.subr.bf16.mxu1 %v4181_v46 }
 0x9e0   :  { %3193 = vmatpush1.bf16.msra.mxu1 %v4199_v51 }
 0x9e1   :  { %3195 = vmatprep.subr.bf16.mxu1 %v4206_v53 }
 0x9e4   :  { %3197 = vmatpush1.bf16.msra.mxu1 %v4224_v58 }
 0x9e5   :  { %3199 = vmatprep.subr.bf16.mxu1 %v4231_v60 }
 0x9e8   :  { %3201 = vmatpush1.bf16.msra.mxu1 %v4249_v1 }
 0x9e9   :  { %3203 = vmatprep.subr.bf16.mxu1 %v4256_v4 }
 0x9ec   :  { %3205 = vmatpush1.bf16.msra.mxu1 %v4268_v7 }
 0x9ed   :  { %2719 = vmatprep.subr.msk.mxu1 %vm438_vm2, %v4351_v28 }
 0x9f0   :  { %2720 = vmatpush1.msk.msra.mxu1 %vm438_vm2, %v4356_v29 }
 0xa9e   :  { %v1291_v48 = vpop.f32.mrb[22].mxu1 }
 0xa9f   :  { %v3793_v49 = vadd.f32 %v1291_v48, %v4397_v45  ;;  %v1293_v50 = vpop.f32.mrb[23].mxu1 }
 0xaa0   :  { %v3794_v52 = vadd.f32 %v1293_v50, %v4399_v47  ;;  %v308_v50 = vadd.f32 %v4425_v57, %v4399_v47  ;;  %v314_v57 = vadd.f32 %v4432_v61, %v4399_v47  ;;  %v320_v61 = vadd.f32 %v4436_v63, %v4399_v47 }
 0xaa1   :  { %v326_v63 = vadd.f32 %v4440_v2, %v4399_v47  ;;  %v332_v2 = vadd.f32 %v4444_v6, %v4399_v47  ;;  %v338_v6 = vadd.f32 %v4448_v9, %v4399_v47  ;;  %v344_v9 = vadd.f32 %v4452_v12, %v4399_v47 }
 0xaa2   :  { %3927 = vtanh.f32 %v3794_v52  ;;  %v350_v12 = vadd.f32 %v4456_v15, %v4399_v47  ;;  %v356_v15 = vadd.f32 %v4460_v17, %v4399_v47  ;;  %v362_v17 = vadd.f32 %v4464_v20, %v4399_v47 }
 0xaa3   :  { %3929 = vtanh.f32 %v3793_v49  ;;  %v306_v49 = vadd.f32 %v4423_v56, %v4397_v45  ;;  %v312_v56 = vadd.f32 %v4430_v59, %v4397_v45  ;;  %v318_v59 = vadd.f32 %v4434_v62, %v4397_v45 }
 0xaa4   :  { %v324_v62 = vadd.f32 %v4438_v0, %v4397_v45  ;;  %v330_v0 = vadd.f32 %v4442_v5, %v4397_v45  ;;  %v336_v5 = vadd.f32 %v4446_v8, %v4397_v45  ;;  %v342_v8 = vadd.f32 %v4450_v11, %v4397_v45 }
 0xaa5   :  { %v348_v11 = vadd.f32 %v4454_v14, %v4397_v45  ;;  %v354_v14 = vadd.f32 %v4458_v16, %v4397_v45  ;;  %v360_v16 = vadd.f32 %v4462_v19, %v4397_v45  ;;  %v366_v19 = vadd.f32 %v4466_v21, %v4397_v45 }
 0xaa6   :  { %v368_v20 = vadd.f32 %v4468_v22, %v4399_v47  ;;  %v372_v21 = vadd.f32 %v4470_v24, %v4397_v45  ;;  %v374_v22 = vadd.f32 %v4472_v26, %v4399_v47  ;;  %v378_v24 = vadd.f32 %v4474_v27, %v4397_v45 }
 0xaa7   :  { %v380_v26 = vadd.f32 %v4476_v31, %v4399_v47  ;;  %v384_v31 = vadd.f32 %v4478_v33, %v4397_v45  ;;  %v2561_v33 = vld [vmem:[%s5202_s4 + $0x68] sm:$0xff] }
 0xaac   :  { %v3928_v54 = vpop.eup %3927 }
 0xaad   :  { %v3930_v55 = vpop.eup %3929  ;;  %2721 = vmatprep.mubr.msk.f32.mxu1 %vm434_vm3, %v3928_v54 }
 0xaae   :  { %1368 = vmatmul.mubr.f32.vlgmr.msra.gmra.mrb[24].mxu1 %v3930_v55 }
 0xb81   :  { %v1369_v38 = vpop.f32.mrb[24].mxu1 }
 0xb82   :  { %v3795_v40 = vadd.f32 %v1369_v38, %v4397_v45  ;;  %v1371_v41 = vpop.f32.mrb[25].mxu1 }
 0xb83   :  { %v3796_v42 = vadd.f32 %v1371_v41, %v4399_v47 }
 0xb85   :  { %3931 = vtanh.f32 %v3796_v42 }
 0xb86   :  { %3933 = vtanh.f32 %v3795_v40 }
 0xb8f   :  { %v3932_v43 = vpop.eup %3931 }
 0xb90   :  { %v3934_v48 = vpop.eup %3933  ;;  %2724 = vmatprep.mubr.msk.f32.mxu0 %vm434_vm3, %v3932_v43 }
 0xb91   :  { %1446 = vmatmul.mubr.f32.vlgmr.msra.gmra.mrb[0].mxu0 %v3934_v48 }
 0xb92   :  { %3245 = vmatpush1.bf16.msra.mxu0 %v4064_v13 }
 0xb93   :  { %3247 = vmatprep.subr.bf16.mxu0 %v4080_v18 }
 0xb96   :  { %3249 = vmatpush1.bf16.msra.mxu0 %v4099_v23 }
 0xb97   :  { %3251 = vmatprep.subr.bf16.mxu0 %v4106_v25 }
 0xb9a   :  { %3253 = vmatpush1.bf16.msra.mxu0 %v4124_v30 }
 0xb9b   :  { %3255 = vmatprep.subr.bf16.mxu0 %v4131_v32 }
 0xb9e   :  { %3257 = vmatpush1.bf16.msra.mxu0 %v4149_v37 }
 0xb9f   :  { %3259 = vmatprep.subr.bf16.mxu0 %v4156_v39 }
 0xba2   :  { %3261 = vmatpush1.bf16.msra.mxu0 %v4174_v44 }
 0xba3   :  { %3263 = vmatprep.subr.bf16.mxu0 %v4181_v46 }
 0xba6   :  { %3265 = vmatpush1.bf16.msra.mxu0 %v4199_v51 }
 0xba7   :  { %3267 = vmatprep.subr.bf16.mxu0 %v4206_v53 }
 0xbaa   :  { %3269 = vmatpush1.bf16.msra.mxu0 %v4224_v58 }
 0xbab   :  { %3271 = vmatprep.subr.bf16.mxu0 %v4231_v60 }
 0xbae   :  { %3273 = vmatpush1.bf16.msra.mxu0 %v4249_v1 }
 0xbaf   :  { %3275 = vmatprep.subr.bf16.mxu0 %v4256_v4 }
 0xbb2   :  { %3277 = vmatpush1.bf16.msra.mxu0 %v4268_v7 }
 0xbb3   :  { %2725 = vmatprep.subr.msk.mxu0 %vm438_vm2, %v4351_v28 }
 0xbb6   :  { %2726 = vmatpush1.msk.msra.mxu0 %vm438_vm2, %v4356_v29 }
 0xbb7   :  { %3279 = vmatprep.subr.bf16.mxu0 %v4056_v10 }
 0xc64   :  { %v1447_v52 = vpop.f32.mrb[0].mxu0 }
 0xc65   :  { %v1452_v54 = vadd.f32 %v1447_v52, %v306_v49  ;;  %v1449_v55 = vpop.f32.mrb[1].mxu0 }
 0xc66   :  { %v1453_v38 = vadd.f32 %v1449_v55, %v308_v50 }
 0xc68   :  { %3935 = vtanh.f32 %v1453_v38 }
 0xc69   :  { %3937 = vtanh.f32 %v1452_v54 }
 0xc72   :  { %v3936_v40 = vpop.eup %3935 }
 0xc73   :  { %v3938_v41 = vpop.eup %3937  ;;  %2727 = vmatprep.mubr.msk.f32.mxu0 %vm434_vm3, %v3936_v40 }
 0xc74   :  { %1524 = vmatmul.mubr.f32.vlgmr.msra.gmra.mrb[2].mxu0 %v3938_v41 }
 0xc75   :  { %3281 = vmatpush1.bf16.msra.mxu0 %v4064_v13 }
 0xc76   :  { %3283 = vmatprep.subr.bf16.mxu0 %v4080_v18 }
 0xc79   :  { %3285 = vmatpush1.bf16.msra.mxu0 %v4099_v23 }
 0xc7a   :  { %3287 = vmatprep.subr.bf16.mxu0 %v4106_v25 }
 0xc7d   :  { %3289 = vmatpush1.bf16.msra.mxu0 %v4124_v30 }
 0xc7e   :  { %3291 = vmatprep.subr.bf16.mxu0 %v4131_v32 }
 0xc81   :  { %3293 = vmatpush1.bf16.msra.mxu0 %v4149_v37 }
 0xc82   :  { %3295 = vmatprep.subr.bf16.mxu0 %v4156_v39 }
 0xc85   :  { %3297 = vmatpush1.bf16.msra.mxu0 %v4174_v44 }
 0xc86   :  { %3299 = vmatprep.subr.bf16.mxu0 %v4181_v46 }
 0xc89   :  { %3301 = vmatpush1.bf16.msra.mxu0 %v4199_v51 }
 0xc8a   :  { %3303 = vmatprep.subr.bf16.mxu0 %v4206_v53 }
 0xc8d   :  { %3305 = vmatpush1.bf16.msra.mxu0 %v4224_v58 }
 0xc8e   :  { %3307 = vmatprep.subr.bf16.mxu0 %v4231_v60 }
 0xc91   :  { %3309 = vmatpush1.bf16.msra.mxu0 %v4249_v1 }
 0xc92   :  { %3311 = vmatprep.subr.bf16.mxu0 %v4256_v4 }
 0xc95   :  { %3313 = vmatpush1.bf16.msra.mxu0 %v4268_v7 }
 0xc96   :  { %2728 = vmatprep.subr.msk.mxu0 %vm438_vm2, %v4351_v28 }
 0xc99   :  { %2729 = vmatpush1.msk.msra.mxu0 %vm438_vm2, %v4356_v29 }
 0xc9a   :  { %3315 = vmatprep.subr.bf16.mxu0 %v4056_v10 }
 0xd47   :  { %v1525_v42 = vpop.f32.mrb[2].mxu0 }
 0xd48   :  { %v1530_v43 = vadd.f32 %v1525_v42, %v312_v56  ;;  %v1527_v48 = vpop.f32.mrb[3].mxu0 }
 0xd49   :  { %v1531_v49 = vadd.f32 %v1527_v48, %v314_v57 }
 0xd4b   :  { %3939 = vtanh.f32 %v1531_v49 }
 0xd4c   :  { %3941 = vtanh.f32 %v1530_v43 }
 0xd55   :  { %v3940_v50 = vpop.eup %3939 }
 0xd56   :  { %v3942_v52 = vpop.eup %3941  ;;  %2730 = vmatprep.mubr.msk.f32.mxu0 %vm434_vm3, %v3940_v50 }
 0xd57   :  { %1602 = vmatmul.mubr.f32.vlgmr.msra.gmra.mrb[4].mxu0 %v3942_v52 }
 0xd58   :  { %3317 = vmatpush1.bf16.msra.mxu0 %v4064_v13 }
 0xd59   :  { %3319 = vmatprep.subr.bf16.mxu0 %v4080_v18 }
 0xd5c   :  { %3321 = vmatpush1.bf16.msra.mxu0 %v4099_v23 }
 0xd5d   :  { %3323 = vmatprep.subr.bf16.mxu0 %v4106_v25 }
 0xd60   :  { %3325 = vmatpush1.bf16.msra.mxu0 %v4124_v30 }
 0xd61   :  { %3327 = vmatprep.subr.bf16.mxu0 %v4131_v32 }
 0xd64   :  { %3329 = vmatpush1.bf16.msra.mxu0 %v4149_v37 }
 0xd65   :  { %3331 = vmatprep.subr.bf16.mxu0 %v4156_v39 }
 0xd68   :  { %3333 = vmatpush1.bf16.msra.mxu0 %v4174_v44 }
 0xd69   :  { %3335 = vmatprep.subr.bf16.mxu0 %v4181_v46 }
 0xd6c   :  { %3337 = vmatpush1.bf16.msra.mxu0 %v4199_v51 }
 0xd6d   :  { %3339 = vmatprep.subr.bf16.mxu0 %v4206_v53 }
 0xd70   :  { %3341 = vmatpush1.bf16.msra.mxu0 %v4224_v58 }
 0xd71   :  { %3343 = vmatprep.subr.bf16.mxu0 %v4231_v60 }
 0xd74   :  { %3345 = vmatpush1.bf16.msra.mxu0 %v4249_v1 }
 0xd75   :  { %3347 = vmatprep.subr.bf16.mxu0 %v4256_v4 }
 0xd78   :  { %3349 = vmatpush1.bf16.msra.mxu0 %v4268_v7 }
 0xd79   :  { %2731 = vmatprep.subr.msk.mxu0 %vm438_vm2, %v4351_v28  ;;  %v4842_v28 = vld [vmem:[%s5199_s2 + $0x128] sm:$0x3f] }
 0xd7c   :  { %2732 = vmatpush1.msk.msra.mxu0 %vm438_vm2, %v4356_v29  ;;  %v4849_v29 = vld [vmem:[%s5199_s2 + $0x120] sm:$0x3f] }
 0xd7d   :  { %3351 = vmatprep.subr.bf16.mxu0 %v4056_v10 }
 0xe2a   :  { %v1603_v54 = vpop.f32.mrb[4].mxu0 }
 0xe2b   :  { %v1608_v55 = vadd.f32 %v1603_v54, %v318_v59  ;;  %v1605_v38 = vpop.f32.mrb[5].mxu0 }
 0xe2c   :  { %v1609_v40 = vadd.f32 %v1605_v38, %v320_v61 }
 0xe2e   :  { %3943 = vtanh.f32 %v1609_v40 }
 0xe2f   :  { %3945 = vtanh.f32 %v1608_v55 }
 0xe38   :  { %v3944_v41 = vpop.eup %3943 }
 0xe39   :  { %v3946_v56 = vpop.eup %3945  ;;  %2733 = vmatprep.mubr.msk.f32.mxu0 %vm434_vm3, %v3944_v41 }
 0xe3a   :  { %1680 = vmatmul.mubr.f32.vlgmr.msra.gmra.mrb[6].mxu0 %v3946_v56 }
 0xe3b   :  { %3353 = vmatpush1.bf16.msra.mxu0 %v4064_v13 }
 0xe3c   :  { %3355 = vmatprep.subr.bf16.mxu0 %v4080_v18 }
 0xe3f   :  { %3357 = vmatpush1.bf16.msra.mxu0 %v4099_v23 }
 0xe40   :  { %3359 = vmatprep.subr.bf16.mxu0 %v4106_v25 }
 0xe43   :  { %3361 = vmatpush1.bf16.msra.mxu0 %v4124_v30 }
 0xe44   :  { %3363 = vmatprep.subr.bf16.mxu0 %v4131_v32 }
 0xe47   :  { %3365 = vmatpush1.bf16.msra.mxu0 %v4149_v37 }
 0xe48   :  { %3367 = vmatprep.subr.bf16.mxu0 %v4156_v39 }
 0xe4b   :  { %3369 = vmatpush1.bf16.msra.mxu0 %v4174_v44 }
 0xe4c   :  { %3371 = vmatprep.subr.bf16.mxu0 %v4181_v46 }
 0xe4f   :  { %3373 = vmatpush1.bf16.msra.mxu0 %v4199_v51 }
 0xe50   :  { %3375 = vmatprep.subr.bf16.mxu0 %v4206_v53 }
 0xe53   :  { %3377 = vmatpush1.bf16.msra.mxu0 %v4224_v58 }
 0xe54   :  { %3379 = vmatprep.subr.bf16.mxu0 %v4231_v60 }
 0xe57   :  { %3381 = vmatpush1.bf16.msra.mxu0 %v4249_v1 }
 0xe58   :  { %3383 = vmatprep.subr.bf16.mxu0 %v4256_v4 }
 0xe5b   :  { %3385 = vmatpush1.bf16.msra.mxu0 %v4268_v7 }
 0xe5c   :  { %2734 = vmatprep.subr.msk.mxu0 %vm438_vm2, %v4842_v28 }
 0xe5f   :  { %2735 = vmatpush1.msk.msra.mxu0 %vm438_vm2, %v4849_v29 }
 0xe60   :  { %3387 = vmatprep.subr.bf16.mxu0 %v4056_v10 }
 0xf0d   :  { %v1681_v57 = vpop.f32.mrb[6].mxu0 }
 0xf0e   :  { %v1686_v42 = vadd.f32 %v1681_v57, %v324_v62  ;;  %v1683_v43 = vpop.f32.mrb[7].mxu0 }
 0xf0f   :  { %v1687_v48 = vadd.f32 %v1683_v43, %v326_v63 }
 0xf11   :  { %3947 = vtanh.f32 %v1687_v48 }
 0xf12   :  { %3949 = vtanh.f32 %v1686_v42 }
 0xf1b   :  { %v3948_v49 = vpop.eup %3947 }
 0xf1c   :  { %v3950_v50 = vpop.eup %3949  ;;  %2736 = vmatprep.mubr.msk.f32.mxu0 %vm434_vm3, %v3948_v49 }
 0xf1d   :  { %1758 = vmatmul.mubr.f32.vlgmr.msra.gmra.mrb[8].mxu0 %v3950_v50 }
 0xf1e   :  { %3389 = vmatpush1.bf16.msra.mxu0 %v4064_v13 }
 0xf1f   :  { %3391 = vmatprep.subr.bf16.mxu0 %v4080_v18 }
 0xf22   :  { %3393 = vmatpush1.bf16.msra.mxu0 %v4099_v23 }
 0xf23   :  { %3395 = vmatprep.subr.bf16.mxu0 %v4106_v25 }
 0xf26   :  { %3397 = vmatpush1.bf16.msra.mxu0 %v4124_v30 }
 0xf27   :  { %3399 = vmatprep.subr.bf16.mxu0 %v4131_v32 }
 0xf2a   :  { %3401 = vmatpush1.bf16.msra.mxu0 %v4149_v37 }
 0xf2b   :  { %3403 = vmatprep.subr.bf16.mxu0 %v4156_v39 }
 0xf2e   :  { %3405 = vmatpush1.bf16.msra.mxu0 %v4174_v44 }
 0xf2f   :  { %3407 = vmatprep.subr.bf16.mxu0 %v4181_v46 }
 0xf32   :  { %3409 = vmatpush1.bf16.msra.mxu0 %v4199_v51 }
 0xf33   :  { %3411 = vmatprep.subr.bf16.mxu0 %v4206_v53 }
 0xf36   :  { %3413 = vmatpush1.bf16.msra.mxu0 %v4224_v58 }
 0xf37   :  { %3415 = vmatprep.subr.bf16.mxu0 %v4231_v60 }
 0xf3a   :  { %3417 = vmatpush1.bf16.msra.mxu0 %v4249_v1 }
 0xf3b   :  { %3419 = vmatprep.subr.bf16.mxu0 %v4256_v4 }
 0xf3e   :  { %3421 = vmatpush1.bf16.msra.mxu0 %v4268_v7 }
 0xf3f   :  { %2737 = vmatprep.subr.msk.mxu0 %vm438_vm2, %v4842_v28 }
 0xf42   :  { %2738 = vmatpush1.msk.msra.mxu0 %vm438_vm2, %v4849_v29 }
 0xf43   :  { %3423 = vmatprep.subr.bf16.mxu0 %v4056_v10 }
 0xff0   :  { %v1759_v52 = vpop.f32.mrb[8].mxu0 }
 0xff1   :  { %v1764_v59 = vadd.f32 %v1759_v52, %v330_v0  ;;  %v1761_v61 = vpop.f32.mrb[9].mxu0 }
 0xff2   :  { %v1765_v54 = vadd.f32 %v1761_v61, %v332_v2 }
 0xff4   :  { %3951 = vtanh.f32 %v1765_v54 }
 0xff5   :  { %3953 = vtanh.f32 %v1764_v59 }
 0xffe   :  { %v3952_v55 = vpop.eup %3951 }
 0xfff   :  { %v3954_v38 = vpop.eup %3953  ;;  %2739 = vmatprep.mubr.msk.f32.mxu0 %vm434_vm3, %v3952_v55 }
0x1000   :  { %1836 = vmatmul.mubr.f32.vlgmr.msra.gmra.mrb[10].mxu0 %v3954_v38 }
0x1001   :  { %3425 = vmatpush1.bf16.msra.mxu0 %v4064_v13 }
0x1002   :  { %3427 = vmatprep.subr.bf16.mxu0 %v4080_v18 }
0x1005   :  { %3429 = vmatpush1.bf16.msra.mxu0 %v4099_v23 }
0x1006   :  { %3431 = vmatprep.subr.bf16.mxu0 %v4106_v25 }
0x1009   :  { %3433 = vmatpush1.bf16.msra.mxu0 %v4124_v30 }
0x100a   :  { %3435 = vmatprep.subr.bf16.mxu0 %v4131_v32 }
0x100d   :  { %3437 = vmatpush1.bf16.msra.mxu0 %v4149_v37 }
0x100e   :  { %3439 = vmatprep.subr.bf16.mxu0 %v4156_v39 }
0x1011   :  { %3441 = vmatpush1.bf16.msra.mxu0 %v4174_v44 }
0x1012   :  { %3443 = vmatprep.subr.bf16.mxu0 %v4181_v46 }
0x1015   :  { %3445 = vmatpush1.bf16.msra.mxu0 %v4199_v51 }
0x1016   :  { %3447 = vmatprep.subr.bf16.mxu0 %v4206_v53 }
0x1019   :  { %3449 = vmatpush1.bf16.msra.mxu0 %v4224_v58 }
0x101a   :  { %3451 = vmatprep.subr.bf16.mxu0 %v4231_v60 }
0x101d   :  { %3453 = vmatpush1.bf16.msra.mxu0 %v4249_v1 }
0x101e   :  { %3455 = vmatprep.subr.bf16.mxu0 %v4256_v4 }
0x1021   :  { %3457 = vmatpush1.bf16.msra.mxu0 %v4268_v7 }
0x1022   :  { %2740 = vmatprep.subr.msk.mxu0 %vm438_vm2, %v4842_v28 }
0x1025   :  { %2741 = vmatpush1.msk.msra.mxu0 %vm438_vm2, %v4849_v29 }
0x1026   :  { %3459 = vmatprep.subr.bf16.mxu0 %v4056_v10 }
0x10d3   :  { %v1837_v40 = vpop.f32.mrb[10].mxu0 }
0x10d4   :  { %v1842_v41 = vadd.f32 %v1837_v40, %v336_v5  ;;  %v1839_v56 = vpop.f32.mrb[11].mxu0 }
0x10d5   :  { %v1843_v62 = vadd.f32 %v1839_v56, %v338_v6 }
0x10d7   :  { %3955 = vtanh.f32 %v1843_v62 }
0x10d8   :  { %3957 = vtanh.f32 %v1842_v41 }
0x10e1   :  { %v3956_v63 = vpop.eup %3955 }
0x10e2   :  { %v3958_v57 = vpop.eup %3957  ;;  %2742 = vmatprep.mubr.msk.f32.mxu0 %vm434_vm3, %v3956_v63 }
0x10e3   :  { %1914 = vmatmul.mubr.f32.vlgmr.msra.gmra.mrb[12].mxu0 %v3958_v57 }
0x10e4   :  { %3461 = vmatpush1.bf16.msra.mxu0 %v4064_v13 }
0x10e5   :  { %3463 = vmatprep.subr.bf16.mxu0 %v4080_v18 }
0x10e8   :  { %3465 = vmatpush1.bf16.msra.mxu0 %v4099_v23 }
0x10e9   :  { %3467 = vmatprep.subr.bf16.mxu0 %v4106_v25 }
0x10ec   :  { %3469 = vmatpush1.bf16.msra.mxu0 %v4124_v30 }
0x10ed   :  { %3471 = vmatprep.subr.bf16.mxu0 %v4131_v32 }
0x10f0   :  { %3473 = vmatpush1.bf16.msra.mxu0 %v4149_v37 }
0x10f1   :  { %3475 = vmatprep.subr.bf16.mxu0 %v4156_v39 }
0x10f4   :  { %3477 = vmatpush1.bf16.msra.mxu0 %v4174_v44 }
0x10f5   :  { %3479 = vmatprep.subr.bf16.mxu0 %v4181_v46 }
0x10f8   :  { %3481 = vmatpush1.bf16.msra.mxu0 %v4199_v51 }
0x10f9   :  { %3483 = vmatprep.subr.bf16.mxu0 %v4206_v53 }
0x10fc   :  { %3485 = vmatpush1.bf16.msra.mxu0 %v4224_v58 }
0x10fd   :  { %3487 = vmatprep.subr.bf16.mxu0 %v4231_v60 }
0x1100   :  { %3489 = vmatpush1.bf16.msra.mxu0 %v4249_v1 }
0x1101   :  { %3491 = vmatprep.subr.bf16.mxu0 %v4256_v4 }
0x1104   :  { %3493 = vmatpush1.bf16.msra.mxu0 %v4268_v7 }
0x1105   :  { %2743 = vmatprep.subr.msk.mxu0 %vm438_vm2, %v4842_v28 }
0x1108   :  { %2744 = vmatpush1.msk.msra.mxu0 %vm438_vm2, %v4849_v29 }
0x1109   :  { %3495 = vmatprep.subr.bf16.mxu0 %v4056_v10 }
0x11b6   :  { %v1915_v42 = vpop.f32.mrb[12].mxu0 }
0x11b7   :  { %v1920_v43 = vadd.f32 %v1915_v42, %v342_v8  ;;  %v1917_v48 = vpop.f32.mrb[13].mxu0 }
0x11b8   :  { %v1921_v49 = vadd.f32 %v1917_v48, %v344_v9 }
0x11ba   :  { %3959 = vtanh.f32 %v1921_v49 }
0x11bb   :  { %3961 = vtanh.f32 %v1920_v43 }
0x11c4   :  { %v3960_v50 = vpop.eup %3959 }
0x11c5   :  { %v3962_v0 = vpop.eup %3961  ;;  %2745 = vmatprep.mubr.msk.f32.mxu0 %vm434_vm3, %v3960_v50 }
0x11c6   :  { %1992 = vmatmul.mubr.f32.vlgmr.msra.gmra.mrb[14].mxu0 %v3962_v0 }
0x11c7   :  { %3497 = vmatpush1.bf16.msra.mxu0 %v4064_v13 }
0x11c8   :  { %3499 = vmatprep.subr.bf16.mxu0 %v4080_v18 }
0x11cb   :  { %3501 = vmatpush1.bf16.msra.mxu0 %v4099_v23 }
0x11cc   :  { %3503 = vmatprep.subr.bf16.mxu0 %v4106_v25 }
0x11cf   :  { %3505 = vmatpush1.bf16.msra.mxu0 %v4124_v30 }
0x11d0   :  { %3507 = vmatprep.subr.bf16.mxu0 %v4131_v32 }
0x11d3   :  { %3509 = vmatpush1.bf16.msra.mxu0 %v4149_v37 }
0x11d4   :  { %3511 = vmatprep.subr.bf16.mxu0 %v4156_v39 }
0x11d7   :  { %3513 = vmatpush1.bf16.msra.mxu0 %v4174_v44 }
0x11d8   :  { %3515 = vmatprep.subr.bf16.mxu0 %v4181_v46 }
0x11db   :  { %3517 = vmatpush1.bf16.msra.mxu0 %v4199_v51 }
0x11dc   :  { %3519 = vmatprep.subr.bf16.mxu0 %v4206_v53 }
0x11df   :  { %3521 = vmatpush1.bf16.msra.mxu0 %v4224_v58 }
0x11e0   :  { %3523 = vmatprep.subr.bf16.mxu0 %v4231_v60 }
0x11e3   :  { %3525 = vmatpush1.bf16.msra.mxu0 %v4249_v1 }
0x11e4   :  { %3527 = vmatprep.subr.bf16.mxu0 %v4256_v4 }
0x11e7   :  { %3529 = vmatpush1.bf16.msra.mxu0 %v4268_v7 }
0x11e8   :  { %2746 = vmatprep.subr.msk.mxu0 %vm438_vm2, %v4842_v28 }
0x11eb   :  { %2747 = vmatpush1.msk.msra.mxu0 %vm438_vm2, %v4849_v29 }
0x11ec   :  { %3531 = vmatprep.subr.bf16.mxu0 %v4056_v10 }
0x1299   :  { %v1993_v2 = vpop.f32.mrb[14].mxu0 }
0x129a   :  { %v1998_v52 = vadd.f32 %v1993_v2, %v348_v11  ;;  %v1995_v59 = vpop.f32.mrb[15].mxu0 }
0x129b   :  { %v1999_v61 = vadd.f32 %v1995_v59, %v350_v12 }
0x129d   :  { %3963 = vtanh.f32 %v1999_v61 }
0x129e   :  { %3965 = vtanh.f32 %v1998_v52 }
0x12a7   :  { %v3964_v54 = vpop.eup %3963 }
0x12a8   :  { %v3966_v55 = vpop.eup %3965  ;;  %2748 = vmatprep.mubr.msk.f32.mxu0 %vm434_vm3, %v3964_v54 }
0x12a9   :  { %2070 = vmatmul.mubr.f32.vlgmr.msra.gmra.mrb[16].mxu0 %v3966_v55 }
0x12aa   :  { %3533 = vmatpush1.bf16.msra.mxu0 %v4064_v13 }
0x12ab   :  { %3535 = vmatprep.subr.bf16.mxu0 %v4080_v18 }
0x12ae   :  { %3537 = vmatpush1.bf16.msra.mxu0 %v4099_v23 }
0x12af   :  { %3539 = vmatprep.subr.bf16.mxu0 %v4106_v25 }
0x12b2   :  { %3541 = vmatpush1.bf16.msra.mxu0 %v4124_v30 }
0x12b3   :  { %3543 = vmatprep.subr.bf16.mxu0 %v4131_v32 }
0x12b6   :  { %3545 = vmatpush1.bf16.msra.mxu0 %v4149_v37 }
0x12b7   :  { %3547 = vmatprep.subr.bf16.mxu0 %v4156_v39 }
0x12ba   :  { %3549 = vmatpush1.bf16.msra.mxu0 %v4174_v44 }
0x12bb   :  { %3551 = vmatprep.subr.bf16.mxu0 %v4181_v46 }
0x12be   :  { %3553 = vmatpush1.bf16.msra.mxu0 %v4199_v51 }
0x12bf   :  { %3555 = vmatprep.subr.bf16.mxu0 %v4206_v53 }
0x12c2   :  { %3557 = vmatpush1.bf16.msra.mxu0 %v4224_v58 }
0x12c3   :  { %3559 = vmatprep.subr.bf16.mxu0 %v4231_v60 }
0x12c6   :  { %3561 = vmatpush1.bf16.msra.mxu0 %v4249_v1 }
0x12c7   :  { %3563 = vmatprep.subr.bf16.mxu0 %v4256_v4 }
0x12ca   :  { %3565 = vmatpush1.bf16.msra.mxu0 %v4268_v7 }
0x12cb   :  { %2749 = vmatprep.subr.msk.mxu0 %vm438_vm2, %v4842_v28 }
0x12ce   :  { %2750 = vmatpush1.msk.msra.mxu0 %vm438_vm2, %v4849_v29 }
0x12cf   :  { %3567 = vmatprep.subr.bf16.mxu0 %v4056_v10 }
0x137c   :  { %v2071_v38 = vpop.f32.mrb[16].mxu0 }
0x137d   :  { %v2076_v5 = vadd.f32 %v2071_v38, %v354_v14  ;;  %v2073_v6 = vpop.f32.mrb[17].mxu0 }
0x137e   :  { %v2077_v40 = vadd.f32 %v2073_v6, %v356_v15 }
0x1380   :  { %3967 = vtanh.f32 %v2077_v40 }
0x1381   :  { %3969 = vtanh.f32 %v2076_v5 }
0x138a   :  { %v3968_v41 = vpop.eup %3967 }
0x138b   :  { %v3970_v56 = vpop.eup %3969  ;;  %2751 = vmatprep.mubr.msk.f32.mxu0 %vm434_vm3, %v3968_v41 }
0x138c   :  { %2148 = vmatmul.mubr.f32.vlgmr.msra.gmra.mrb[18].mxu0 %v3970_v56 }
0x138d   :  { %3569 = vmatpush1.bf16.msra.mxu0 %v4064_v13 }
0x138e   :  { %3571 = vmatprep.subr.bf16.mxu0 %v4080_v18 }
0x1391   :  { %3573 = vmatpush1.bf16.msra.mxu0 %v4099_v23 }
0x1392   :  { %3575 = vmatprep.subr.bf16.mxu0 %v4106_v25 }
0x1395   :  { %3577 = vmatpush1.bf16.msra.mxu0 %v4124_v30 }
0x1396   :  { %3579 = vmatprep.subr.bf16.mxu0 %v4131_v32 }
0x1399   :  { %3581 = vmatpush1.bf16.msra.mxu0 %v4149_v37 }
0x139a   :  { %3583 = vmatprep.subr.bf16.mxu0 %v4156_v39 }
0x139d   :  { %3585 = vmatpush1.bf16.msra.mxu0 %v4174_v44 }
0x139e   :  { %3587 = vmatprep.subr.bf16.mxu0 %v4181_v46 }
0x13a1   :  { %3589 = vmatpush1.bf16.msra.mxu0 %v4199_v51 }
0x13a2   :  { %3591 = vmatprep.subr.bf16.mxu0 %v4206_v53 }
0x13a5   :  { %3593 = vmatpush1.bf16.msra.mxu0 %v4224_v58 }
0x13a6   :  { %3595 = vmatprep.subr.bf16.mxu0 %v4231_v60 }
0x13a9   :  { %3597 = vmatpush1.bf16.msra.mxu0 %v4249_v1 }
0x13aa   :  { %3599 = vmatprep.subr.bf16.mxu0 %v4256_v4 }
0x13ad   :  { %3601 = vmatpush1.bf16.msra.mxu0 %v4268_v7 }
0x13ae   :  { %2752 = vmatprep.subr.msk.mxu0 %vm438_vm2, %v4842_v28 }
0x13b1   :  { %2753 = vmatpush1.msk.msra.mxu0 %vm438_vm2, %v4849_v29 }
0x13b2   :  { %3603 = vmatprep.subr.bf16.mxu0 %v4056_v10 }
0x145f   :  { %v2149_v62 = vpop.f32.mrb[18].mxu0 }
0x1460   :  { %v2154_v63 = vadd.f32 %v2149_v62, %v360_v16  ;;  %v2151_v57 = vpop.f32.mrb[19].mxu0  ;;  %v2560_v62 = vld [vmem:[%s5202_s4 + $0x60] sm:$0xff] }
0x1461   :  { %v2155_v8 = vadd.f32 %v2151_v57, %v362_v17  ;;  %v2563_v57 = vld [vmem:[%s5202_s4 + $0x78] sm:$0xff] }
0x1463   :  { %3971 = vtanh.f32 %v2155_v8  ;;  %v2564_v8 = vld [vmem:[%s5202_s4 + $0x80] sm:$0xff] }
0x1464   :  { %3973 = vtanh.f32 %v2154_v63  ;;  %v2562_v63 = vld [vmem:[%s5202_s4 + $0x70] sm:$0xff] }
0x146d   :  { %v3972_v9 = vpop.eup %3971 }
0x146e   :  { %v3974_v42 = vpop.eup %3973  ;;  %2754 = vmatprep.mubr.msk.f32.mxu0 %vm434_vm3, %v3972_v9  ;;  %v3768_v9 = vpack.c.bf16 %v2563_v57, %v2562_v63 }
0x146f   :  { %2226 = vmatmul.mubr.f32.vlgmr.msra.gmra.mrb[20].mxu0 %v3974_v42  ;;  %v2565_v42 = vld [vmem:[%s5202_s4 + $0x88] sm:$0xff] }
0x1470   :  { %3605 = vmatpush1.bf16.msra.mxu0 %v4064_v13 }
0x1471   :  { %3607 = vmatprep.subr.bf16.mxu0 %v4080_v18 }
0x1474   :  { %3609 = vmatpush1.bf16.msra.mxu0 %v4099_v23 }
0x1475   :  { %3611 = vmatprep.subr.bf16.mxu0 %v4106_v25 }
0x1478   :  { %3613 = vmatpush1.bf16.msra.mxu0 %v4124_v30 }
0x1479   :  { %3615 = vmatprep.subr.bf16.mxu0 %v4131_v32 }
0x147c   :  { %3617 = vmatpush1.bf16.msra.mxu0 %v4149_v37 }
0x147d   :  { %3619 = vmatprep.subr.bf16.mxu0 %v4156_v39 }
0x1480   :  { %3621 = vmatpush1.bf16.msra.mxu0 %v4174_v44 }
0x1481   :  { %3623 = vmatprep.subr.bf16.mxu0 %v4181_v46 }
0x1484   :  { %3625 = vmatpush1.bf16.msra.mxu0 %v4199_v51 }
0x1485   :  { %3627 = vmatprep.subr.bf16.mxu0 %v4206_v53 }
0x1488   :  { %3629 = vmatpush1.bf16.msra.mxu0 %v4224_v58 }
0x1489   :  { %3631 = vmatprep.subr.bf16.mxu0 %v4231_v60 }
0x148c   :  { %3633 = vmatpush1.bf16.msra.mxu0 %v4249_v1 }
0x148d   :  { %3635 = vmatprep.subr.bf16.mxu0 %v4256_v4 }
0x1490   :  { %3637 = vmatpush1.bf16.msra.mxu0 %v4268_v7 }
0x1491   :  { %2755 = vmatprep.subr.msk.mxu0 %vm438_vm2, %v4842_v28 }
0x1494   :  { %2756 = vmatpush1.msk.msra.mxu0 %vm438_vm2, %v4849_v29 }
0x1495   :  { %3639 = vmatprep.subr.bf16.mxu0 %v4056_v10 }
0x1542   :  { %v2227_v43 = vpop.f32.mrb[20].mxu0 }
0x1543   :  { %v2232_v48 = vadd.f32 %v2227_v43, %v366_v19  ;;  %v2229_v49 = vpop.f32.mrb[21].mxu0  ;;  %v3771_v19 = vpack.c.bf16 %v2565_v42, %v2564_v8  ;;  %v390_v43 = vadd.f32 %v4482_v35, %v4397_v45 }
0x1544   :  { %v2233_v50 = vadd.f32 %v2229_v49, %v368_v20  ;;  %v2566_v20 = vld [vmem:[%s5202_s4 + $0x90] sm:$0x3f] }
0x1546   :  { %3975 = vtanh.f32 %v2233_v50 }
0x1547   :  { %3977 = vtanh.f32 %v2232_v48  ;;  %v392_v48 = vadd.f32 %v4484_v36, %v4399_v47 }
0x1550   :  { %v3976_v0 = vpop.eup %3975 }
0x1551   :  { %v3978_v11 = vpop.eup %3977  ;;  %2757 = vmatprep.mubr.msk.f32.mxu0 %vm434_vm3, %v3976_v0 }
0x1552   :  { %2304 = vmatmul.mubr.f32.vlgmr.msra.gmra.mrb[22].mxu0 %v3978_v11 }
0x1553   :  { %3641 = vmatpush1.bf16.msra.mxu0 %v4064_v13 }
0x1554   :  { %3643 = vmatprep.subr.bf16.mxu0 %v4080_v18 }
0x1557   :  { %3645 = vmatpush1.bf16.msra.mxu0 %v4099_v23 }
0x1558   :  { %3647 = vmatprep.subr.bf16.mxu0 %v4106_v25 }
0x155b   :  { %3649 = vmatpush1.bf16.msra.mxu0 %v4124_v30 }
0x155c   :  { %3651 = vmatprep.subr.bf16.mxu0 %v4131_v32 }
0x155f   :  { %3653 = vmatpush1.bf16.msra.mxu0 %v4149_v37 }
0x1560   :  { %3655 = vmatprep.subr.bf16.mxu0 %v4156_v39 }
0x1563   :  { %3657 = vmatpush1.bf16.msra.mxu0 %v4174_v44 }
0x1564   :  { %3659 = vmatprep.subr.bf16.mxu0 %v4181_v46 }
0x1567   :  { %3661 = vmatpush1.bf16.msra.mxu0 %v4199_v51 }
0x1568   :  { %3663 = vmatprep.subr.bf16.mxu0 %v4206_v53 }
0x156b   :  { %3665 = vmatpush1.bf16.msra.mxu0 %v4224_v58 }
0x156c   :  { %3667 = vmatprep.subr.bf16.mxu0 %v4231_v60 }
0x156f   :  { %3669 = vmatpush1.bf16.msra.mxu0 %v4249_v1 }
0x1570   :  { %3671 = vmatprep.subr.bf16.mxu0 %v4256_v4 }
0x1573   :  { %3673 = vmatpush1.bf16.msra.mxu0 %v4268_v7 }
0x1574   :  { %2758 = vmatprep.subr.msk.mxu0 %vm438_vm2, %v4842_v28 }
0x1577   :  { %2759 = vmatpush1.msk.msra.mxu0 %vm438_vm2, %v4849_v29 }
0x1578   :  { %3675 = vmatprep.subr.bf16.mxu0 %v4056_v10 }
0x1625   :  { %v2305_v12 = vpop.f32.mrb[22].mxu0 }
0x1626   :  { %v2310_v2 = vadd.f32 %v2305_v12, %v372_v21  ;;  %v2307_v52 = vpop.f32.mrb[23].mxu0 }
0x1627   :  { %v2311_v59 = vadd.f32 %v2307_v52, %v374_v22  ;;  %v2767_v22 = vld [vmem:[%s5203_s5] ss:$0 sm:$0xff] }
0x1629   :  { %3979 = vtanh.f32 %v2311_v59 }
0x162a   :  { %3981 = vtanh.f32 %v2310_v2 }
0x1633   :  { %v3980_v61 = vpop.eup %3979 }
0x1634   :  { %v3982_v54 = vpop.eup %3981  ;;  %2760 = vmatprep.mubr.msk.f32.mxu0 %vm434_vm3, %v3980_v61 }
0x1635   :  { %2382 = vmatmul.mubr.f32.vlgmr.msra.gmra.mrb[24].mxu0 %v3982_v54 }
0x1636   :  { %3677 = vmatpush1.bf16.msra.mxu0 %v4064_v13 }
0x1637   :  { %3679 = vmatprep.subr.bf16.mxu0 %v4080_v18 }
0x163a   :  { %3681 = vmatpush1.bf16.msra.mxu0 %v4099_v23 }
0x163b   :  { %3683 = vmatprep.subr.bf16.mxu0 %v4106_v25 }
0x163e   :  { %3685 = vmatpush1.bf16.msra.mxu0 %v4124_v30 }
0x163f   :  { %3687 = vmatprep.subr.bf16.mxu0 %v4131_v32 }
0x1642   :  { %3689 = vmatpush1.bf16.msra.mxu0 %v4149_v37 }
0x1643   :  { %3691 = vmatprep.subr.bf16.mxu0 %v4156_v39 }
0x1646   :  { %3693 = vmatpush1.bf16.msra.mxu0 %v4174_v44 }
0x1647   :  { %3695 = vmatprep.subr.bf16.mxu0 %v4181_v46 }
0x164a   :  { %3697 = vmatpush1.bf16.msra.mxu0 %v4199_v51 }
0x164b   :  { %3699 = vmatprep.subr.bf16.mxu0 %v4206_v53 }
0x164e   :  { %3701 = vmatpush1.bf16.msra.mxu0 %v4224_v58 }
0x164f   :  { %3703 = vmatprep.subr.bf16.mxu0 %v4231_v60 }
0x1652   :  { %3705 = vmatpush1.bf16.msra.mxu0 %v4249_v1 }
0x1653   :  { %3707 = vmatprep.subr.bf16.mxu0 %v4256_v4 }
0x1656   :  { %3709 = vmatpush1.bf16.msra.mxu0 %v4268_v7 }
0x1657   :  { %2761 = vmatprep.subr.msk.mxu0 %vm438_vm2, %v4842_v28 }
0x165a   :  { %2762 = vmatpush1.msk.msra.mxu0 %vm438_vm2, %v4849_v29 }
0x165b   :  { %3711 = vmatprep.subr.bf16.mxu0 %v4056_v10  ;;  %v3998_v10 = vmov 0.0|0.0  }
0x165c   :  { %3746 = vmatprep.subr.bf16.mxu1 %v3998_v10 }
0x1708   :  { %v2383_v55 = vpop.f32.mrb[24].mxu0 }
0x1709   :  { %v2388_v14 = vadd.f32 %v2383_v55, %v378_v24  ;;  %v2385_v15 = vpop.f32.mrb[25].mxu0 }
0x170a   :  { %v2389_v38 = vadd.f32 %v2385_v15, %v380_v26 }
0x170c   :  { %3983 = vtanh.f32 %v2389_v38 }
0x170d   :  { %3985 = vtanh.f32 %v2388_v14 }
0x1716   :  { %v3984_v5 = vpop.eup %3983 }
0x1717   :  { %v3986_v6 = vpop.eup %3985  ;;  %2763 = vmatprep.mubr.msk.f32.mxu0 %vm434_vm3, %v3984_v5 }
0x1718   :  { %2460 = vmatmul.mubr.f32.vlgmr.msra.gmra.mrb[26].mxu0 %v3986_v6 }
0x1719   :  { %3713 = vmatpush1.bf16.msra.mxu0 %v4064_v13  ;;  %v2548_v13 = vld [vmem:[%s5202_s4] sm:$0xff] }
0x171a   :  { %3715 = vmatprep.subr.bf16.mxu0 %v4080_v18  ;;  %v2549_v18 = vld [vmem:[%s5202_s4 + $0x8] sm:$0xff] }
0x171d   :  { %3717 = vmatpush1.bf16.msra.mxu0 %v4099_v23  ;;  %v2550_v23 = vld [vmem:[%s5202_s4 + $0x10] sm:$0xff] }
0x171e   :  { %3719 = vmatprep.subr.bf16.mxu0 %v4106_v25  ;;  %v3747_v25 = vpack.c.bf16 %v2549_v18, %v2548_v13 }
0x1720   :  { %3748 = vmatpush1.bf16.msra.mxu1 %v3747_v25 }
0x1721   :  { %3721 = vmatpush1.bf16.msra.mxu0 %v4124_v30  ;;  %v2551_v30 = vld [vmem:[%s5202_s4 + $0x18] sm:$0xff]  ;;  %3749 = vmatprep.subr.bf16.mxu1 %v3998_v10 }
0x1722   :  { %3723 = vmatprep.subr.bf16.mxu0 %v4131_v32  ;;  %v3750_v32 = vpack.c.bf16 %v2551_v30, %v2550_v23 }
0x1724   :  { %3751 = vmatpush1.bf16.msra.mxu1 %v3750_v32 }
0x1725   :  { %3725 = vmatpush1.bf16.msra.mxu0 %v4149_v37  ;;  %v2552_v37 = vld [vmem:[%s5202_s4 + $0x20] sm:$0xff]  ;;  %3752 = vmatprep.subr.bf16.mxu1 %v3998_v10 }
0x1726   :  { %3727 = vmatprep.subr.bf16.mxu0 %v4156_v39  ;;  %v2553_v39 = vld [vmem:[%s5202_s4 + $0x28] sm:$0xff] }
0x1729   :  { %3729 = vmatpush1.bf16.msra.mxu0 %v4174_v44  ;;  %v3753_v44 = vpack.c.bf16 %v2553_v39, %v2552_v37 }
0x172a   :  { %3731 = vmatprep.subr.bf16.mxu0 %v4181_v46  ;;  %v2554_v46 = vld [vmem:[%s5202_s4 + $0x30] sm:$0xff] }
0x172b   :  { %3754 = vmatpush1.bf16.msra.mxu1 %v3753_v44 }
0x172c   :  { %3755 = vmatprep.subr.bf16.mxu1 %v3998_v10 }
0x172d   :  { %3733 = vmatpush1.bf16.msra.mxu0 %v4199_v51  ;;  %v2555_v51 = vld [vmem:[%s5202_s4 + $0x38] sm:$0xff] }
0x172e   :  { %3735 = vmatprep.subr.bf16.mxu0 %v4206_v53  ;;  %v3756_v53 = vpack.c.bf16 %v2555_v51, %v2554_v46 }
0x1730   :  { %3757 = vmatpush1.bf16.msra.mxu1 %v3756_v53 }
0x1731   :  { %3737 = vmatpush1.bf16.msra.mxu0 %v4224_v58  ;;  %v2556_v58 = vld [vmem:[%s5202_s4 + $0x40] sm:$0xff]  ;;  %3758 = vmatprep.subr.bf16.mxu1 %v3998_v10 }
0x1732   :  { %3739 = vmatprep.subr.bf16.mxu0 %v4231_v60  ;;  %v2557_v60 = vld [vmem:[%s5202_s4 + $0x48] sm:$0xff] }
0x1735   :  { %3741 = vmatpush1.bf16.msra.mxu0 %v4249_v1  ;;  %v3759_v1 = vpack.c.bf16 %v2557_v60, %v2556_v58 }
0x1736   :  { %3743 = vmatprep.subr.bf16.mxu0 %v4256_v4  ;;  %v2558_v4 = vld [vmem:[%s5202_s4 + $0x50] sm:$0xff] }
0x1737   :  { %3760 = vmatpush1.bf16.msra.mxu1 %v3759_v1 }
0x1738   :  { %3761 = vmatprep.subr.bf16.mxu1 %v3998_v10 }
0x1739   :  { %3745 = vmatpush1.bf16.msra.mxu0 %v4268_v7  ;;  %v2559_v7 = vld [vmem:[%s5202_s4 + $0x58] sm:$0xff] }
0x173a   :  { %2764 = vmatprep.subr.msk.mxu0 %vm438_vm2, %v4842_v28  ;;  %v3762_v27 = vpack.c.bf16 %v2559_v7, %v2558_v4  ;;  %v386_v28 = vadd.f32 %v4480_v34, %v4399_v47  ;;  %v3765_v34 = vpack.c.bf16 %v2561_v33, %v2560_v62 }
0x173c   :  { %3763 = vmatpush1.bf16.msra.mxu1 %v3762_v27 }
0x173d   :  { %2765 = vmatpush1.msk.msra.mxu0 %vm438_vm2, %v4849_v29  ;;  %3764 = vmatprep.subr.bf16.mxu1 %v3998_v10 }
0x1740   :  { %3766 = vmatpush1.bf16.msra.mxu1 %v3765_v34 }
0x1741   :  { %3767 = vmatprep.subr.bf16.mxu1 %v3998_v10 }
0x1744   :  { %3769 = vmatpush1.bf16.msra.mxu1 %v3768_v9 }
0x1745   :  { %3770 = vmatprep.subr.bf16.mxu1 %v3998_v10 }
0x1748   :  { %3772 = vmatpush1.bf16.msra.mxu1 %v3771_v19 }
0x1749   :  { %2616 = vmatprep.subr.mxu1 %v3997_v3 }
0x174c   :  { %2768 = vmatpush1.msk.msra.mxu1 %vm438_vm2, %v2566_v20 }
0x17eb   :  { %v2461_v29 = vpop.f32.mrb[26].mxu0 }
0x17ec   :  { %v2466_v40 = vadd.f32 %v2461_v29, %v384_v31  ;;  %v2463_v41 = vpop.f32.mrb[27].mxu0 }
0x17ed   :  { %v2467_v56 = vadd.f32 %v2463_v41, %v386_v28 }
0x17ef   :  { %3987 = vtanh.f32 %v2467_v56 }
0x17f0   :  { %3989 = vtanh.f32 %v2466_v40 }
0x17f9   :  { %v3988_v16 = vpop.eup %3987 }
0x17fa   :  { %v3990_v17 = vpop.eup %3989  ;;  %2766 = vmatprep.mubr.msk.f32.mxu0 %vm434_vm3, %v3988_v16 }
0x17fb   :  { %2538 = vmatmul.mubr.f32.vlgmr.msra.gmra.mrb[28].mxu0 %v3990_v17 }
0x18ce   :  { %v2539_v49 = vpop.f32.mrb[28].mxu0 }
0x18cf   :  { %v2544_v50 = vadd.f32 %v2539_v49, %v390_v43  ;;  %v2541_v0 = vpop.f32.mrb[29].mxu0 }
0x18d0   :  { %v2545_v11 = vadd.f32 %v2541_v0, %v392_v48 }
0x18d2   :  { %3991 = vtanh.f32 %v2545_v11 }
0x18d3   :  { %3993 = vtanh.f32 %v2544_v50 }
0x18dc   :  { %v3992_v21 = vpop.eup %3991 }
0x18dd   :  { %v3994_v3 = vpop.eup %3993  ;;  %2769 = vmatprep.mubr.msk.f32.mxu1 %vm434_vm3, %v3992_v21 }
0x18de   :  { %2645 = vmatmul.mubr.f32.vlgmr.msra.gmra.mrb[56].mxu1 %v3994_v3 }
0x19b1   :  { %v2646_v12 = vpop.f32.mrb[56].mxu1 }
0x19b2   :  { %v2647_v45 = vadd.f32 %v2767_v22, %v2646_v12  ;;  %v2648_v35 = vpop.f32.mrb[57].mxu1 }
0x19b4   :  { %2651 = vst.msk [vmem:[%s5204_s6] sm:$0xff] %vm2650_vm4, %v2647_v45 }

</bundles_post_ra>
